<compile_context>
chip_gen: v6e
topology: v6e:2x2x1
jax: 0.10.0
libtpu: 0.0.40
codegen_flags: <defaults>
</compile_context>

<pallas_src>
import functools

import jax
import jax.numpy as jnp
import numpy as np
from jax.experimental import pallas as pl
from jax.experimental.pallas import tpu as pltpu


def lr_kernel(x_ref, w_ref, bias_ref, out_ref, *, binarize, v_sub, n_sub):
    # x_ref:    (L, B_t)    int32 token ids (positions on sublanes, batch on lanes)
    # w_ref:    (V_pad, 1)  f32 full embedding column (zero-padded rows >= V)
    # bias_ref: (1,)        f32 scalar bias in SMEM
    # out_ref:  (1, B_t)    f32 output, batch lane-dense
    L, B = x_ref.shape

    # Hoisted once per kernel body: local vocab iota over sublanes. The global
    # offset is added once per sub-tile (amortized over the L inner iterations).
    iota_local = jax.lax.broadcasted_iota(jnp.int32, (v_sub, B), 0)

    def subtile(s, acc):
        v_base = s * v_sub
        iota_v = iota_local + v_base                        # (v_sub, B) vocab ids

        def pos(i, counts):
            tok = x_ref[pl.ds(i, 1), :]                     # (1, B) lane-aligned row
            return counts + (iota_v == tok).astype(jnp.float32)

        counts = jax.lax.fori_loop(                          # stays in vregs
            0, L, pos, jnp.zeros((v_sub, B), jnp.float32),
            unroll=True if L <= 32 else 8)

        if binarize:                                         # per-column set() de-dup
            counts = jnp.minimum(counts, 1.0)

        off = pl.multiple_of(v_base, v_sub)
        w_col = w_ref[pl.ds(off, v_sub), :]                  # (v_sub, 1)
        # Weighted sublane reduce for this sub-tile: (v_sub, B)*(v_sub, 1) -> (1, B).
        partial = jnp.sum(counts * w_col, axis=0, keepdims=True)
        return acc + partial

    acc = jax.lax.fori_loop(0, n_sub, subtile,
                            jnp.zeros((1, B), jnp.float32))
    out_ref[...] = acc + bias_ref[0]


def lr_forward(x, weight, bias, *, binarize=False, b_tile=128, v_sub=128):
    """x: (L, B) int token ids; weight: (V, 1) f32; bias: (1,) f32 -> (B,) f32."""
    L, B = x.shape
    V = weight.shape[0]

    x = x.astype(jnp.int32)
    weight = jnp.asarray(weight, jnp.float32).reshape(V, 1)
    bias = jnp.asarray(bias).reshape((1,)).astype(jnp.float32)

    # Only the tiny weight column is padded (zeros; padded rows are never hit by
    # in-range token ids and contribute 0 anyway). x / output are NOT padded.
    V_pad = pl.cdiv(V, v_sub) * v_sub
    if V_pad != V:
        weight = jnp.pad(weight, ((0, V_pad - V), (0, 0)))
    n_sub = V_pad // v_sub

    # Batch tiling: full-batch block if small, else 128-lane tiles; a ragged
    # last block is handled by Pallas (masked output store).
    B_t = B if B < b_tile else b_tile
    grid = (pl.cdiv(B, B_t),)

    out = pl.pallas_call(
        functools.partial(lr_kernel, binarize=binarize, v_sub=v_sub, n_sub=n_sub),
        out_shape=jax.ShapeDtypeStruct((1, B), jnp.float32),
        grid=grid,
        in_specs=[
            pl.BlockSpec((L, B_t), lambda bi: (0, bi)),            # x tokens
            pl.BlockSpec((V_pad, 1), lambda bi: (0, 0)),           # weight column
            pl.BlockSpec(memory_space=pltpu.MemorySpace.SMEM),     # bias scalar
        ],
        out_specs=pl.BlockSpec((1, B_t), lambda bi: (0, bi)),
        compiler_params=pltpu.CompilerParams(
            dimension_semantics=("parallel",)),
    )(x, weight, bias)
    return out[0, :]


if __name__ == "__main__":
    key = jax.random.PRNGKey(0)
    kw, kb, kx, kx2 = jax.random.split(key, 4)

    # --- main shapes: 2 batch tiles x 4 in-kernel vocab sub-tiles -------------
    vsize, length, batch = 512, 16, 256
    weight = jax.random.normal(kw, (vsize, 1), dtype=jnp.float32)
    weight = weight.at[1, 0].set(0.0)          # nn.Embedding(..., padding_idx=1)
    bias = jax.random.normal(kb, (1,), dtype=jnp.float32)
    x = jax.random.randint(kx, (length, batch), 0, vsize, dtype=jnp.int32)

    # default path: lut(input).squeeze(-1).sum(0) + bias
    out = jax.block_until_ready(lr_forward(x, weight, bias, binarize=False))
    ref = weight[x, 0].sum(axis=0) + bias[0]
    assert out.shape == (batch,)
    np.testing.assert_allclose(np.asarray(out), np.asarray(ref),
                               rtol=1e-5, atol=1e-4)

    # binarize path: per-column token de-duplication
    out_b = jax.block_until_ready(lr_forward(x, weight, bias, binarize=True))
    present = (x[:, :, None] == jnp.arange(vsize)[None, None, :]).any(axis=0)
    ref_b = present.astype(jnp.float32) @ weight[:, 0] + bias[0]
    np.testing.assert_allclose(np.asarray(out_b), np.asarray(ref_b),
                               rtol=1e-5, atol=1e-4)

    # --- ragged batch (B % 128 != 0) and non-multiple vocab (V % 128 != 0) ----
    vsize2, batch2 = 500, 200
    weight2 = jax.random.normal(kw, (vsize2, 1), dtype=jnp.float32)
    x2 = jax.random.randint(kx2, (length, batch2), 0, vsize2, dtype=jnp.int32)
    out2 = jax.block_until_ready(lr_forward(x2, weight2, bias, binarize=False))
    ref2 = weight2[x2, 0].sum(axis=0) + bias[0]
    assert out2.shape == (batch2,)
    np.testing.assert_allclose(np.asarray(out2), np.asarray(ref2),
                               rtol=1e-5, atol=1e-4)

    print("KERNEL_OK")
</pallas_src>

<mosaic_0001>
module attributes {stable_mosaic.version = 11 : i64} {
  func.func @lr_kernel(%arg0: i32, %arg1: memref<16x128xi32, #tpu.memory_space<vmem>>, %arg2: memref<512x1xf32, #tpu.memory_space<vmem>>, %arg3: memref<1xf32, #tpu.memory_space<smem>>, %arg4: memref<1x128xf32, #tpu.memory_space<vmem>>) attributes {dimension_semantics = [#tpu.dimension_semantics<parallel>], iteration_bounds = array<i64: 2>, scalar_prefetch = 0 : i64, scratch_operands = 0 : i64, tpu.core_type = #tpu.core_type<tc>, window_params = [{transform_indices = @transform_0, window_bounds = array<i64: 16, 128>}, {pipeline_mode = #tpu.pipeline_mode<synchronous>, transform_indices = @transform_1, window_bounds = array<i64: 512, 1>}, {transform_indices = @transform_2, window_bounds = array<i64: 1>}, {transform_indices = @transform_3, window_bounds = array<i64: 1, 128>}]} {
    %0 = tpu.iota {dimensions = array<i32: 0>} : vector<128x128xi32>
    %cst = arith.constant 0.000000e+00 : f32
    %1 = vector.broadcast %cst : f32 to vector<1x128xf32>
    %c0_i32 = arith.constant 0 : i32
    %c4_i32 = arith.constant 4 : i32
    %2 = arith.addi %c0_i32, %c4_i32 : i32
    %c1_i32 = arith.constant 1 : i32
    %3 = scf.for %arg5 = %c0_i32 to %2 step %c1_i32 iter_args(%arg6 = %1) -> (vector<1x128xf32>)  : i32 {
      %c128_i32 = arith.constant 128 : i32
      %8 = arith.muli %arg5, %c128_i32 : i32
      %9 = vector.broadcast %8 : i32 to vector<128x128xi32>
      %10 = arith.addi %0, %9 : vector<128x128xi32>
      %cst_3 = arith.constant 0.000000e+00 : f32
      %11 = vector.broadcast %cst_3 : f32 to vector<128x128xf32>
      %c0_i32_4 = arith.constant 0 : i32
      %12 = arith.index_cast %c0_i32_4 : i32 to index
      %c0_5 = arith.constant 0 : index
      %13 = vector.load %arg1[%12, %c0_5] : memref<16x128xi32, #tpu.memory_space<vmem>>, vector<1x128xi32>
      %14 = vector.broadcast %13 : vector<1x128xi32> to vector<128x128xi32>
      %15 = arith.cmpi eq, %10, %14 : vector<128x128xi32>
      %16 = arith.extui %15 : vector<128x128xi1> to vector<128x128xi32>
      %17 = arith.sitofp %16 : vector<128x128xi32> to vector<128x128xf32>
      %18 = arith.addf %11, %17 : vector<128x128xf32>
      %c1_i32_6 = arith.constant 1 : i32
      %19 = arith.index_cast %c1_i32_6 : i32 to index
      %c0_7 = arith.constant 0 : index
      %20 = vector.load %arg1[%19, %c0_7] : memref<16x128xi32, #tpu.memory_space<vmem>>, vector<1x128xi32>
      %21 = vector.broadcast %20 : vector<1x128xi32> to vector<128x128xi32>
      %22 = arith.cmpi eq, %10, %21 : vector<128x128xi32>
      %23 = arith.extui %22 : vector<128x128xi1> to vector<128x128xi32>
      %24 = arith.sitofp %23 : vector<128x128xi32> to vector<128x128xf32>
      %25 = arith.addf %18, %24 : vector<128x128xf32>
      %c2_i32 = arith.constant 2 : i32
      %26 = arith.index_cast %c2_i32 : i32 to index
      %c0_8 = arith.constant 0 : index
      %27 = vector.load %arg1[%26, %c0_8] : memref<16x128xi32, #tpu.memory_space<vmem>>, vector<1x128xi32>
      %28 = vector.broadcast %27 : vector<1x128xi32> to vector<128x128xi32>
      %29 = arith.cmpi eq, %10, %28 : vector<128x128xi32>
      %30 = arith.extui %29 : vector<128x128xi1> to vector<128x128xi32>
      %31 = arith.sitofp %30 : vector<128x128xi32> to vector<128x128xf32>
      %32 = arith.addf %25, %31 : vector<128x128xf32>
      %c3_i32 = arith.constant 3 : i32
      %33 = arith.index_cast %c3_i32 : i32 to index
      %c0_9 = arith.constant 0 : index
      %34 = vector.load %arg1[%33, %c0_9] : memref<16x128xi32, #tpu.memory_space<vmem>>, vector<1x128xi32>
      %35 = vector.broadcast %34 : vector<1x128xi32> to vector<128x128xi32>
      %36 = arith.cmpi eq, %10, %35 : vector<128x128xi32>
      %37 = arith.extui %36 : vector<128x128xi1> to vector<128x128xi32>
      %38 = arith.sitofp %37 : vector<128x128xi32> to vector<128x128xf32>
      %39 = arith.addf %32, %38 : vector<128x128xf32>
      %c4_i32_10 = arith.constant 4 : i32
      %40 = arith.index_cast %c4_i32_10 : i32 to index
      %c0_11 = arith.constant 0 : index
      %41 = vector.load %arg1[%40, %c0_11] : memref<16x128xi32, #tpu.memory_space<vmem>>, vector<1x128xi32>
      %42 = vector.broadcast %41 : vector<1x128xi32> to vector<128x128xi32>
      %43 = arith.cmpi eq, %10, %42 : vector<128x128xi32>
      %44 = arith.extui %43 : vector<128x128xi1> to vector<128x128xi32>
      %45 = arith.sitofp %44 : vector<128x128xi32> to vector<128x128xf32>
      %46 = arith.addf %39, %45 : vector<128x128xf32>
      %c5_i32 = arith.constant 5 : i32
      %47 = arith.index_cast %c5_i32 : i32 to index
      %c0_12 = arith.constant 0 : index
      %48 = vector.load %arg1[%47, %c0_12] : memref<16x128xi32, #tpu.memory_space<vmem>>, vector<1x128xi32>
      %49 = vector.broadcast %48 : vector<1x128xi32> to vector<128x128xi32>
      %50 = arith.cmpi eq, %10, %49 : vector<128x128xi32>
      %51 = arith.extui %50 : vector<128x128xi1> to vector<128x128xi32>
      %52 = arith.sitofp %51 : vector<128x128xi32> to vector<128x128xf32>
      %53 = arith.addf %46, %52 : vector<128x128xf32>
      %c6_i32 = arith.constant 6 : i32
      %54 = arith.index_cast %c6_i32 : i32 to index
      %c0_13 = arith.constant 0 : index
      %55 = vector.load %arg1[%54, %c0_13] : memref<16x128xi32, #tpu.memory_space<vmem>>, vector<1x128xi32>
      %56 = vector.broadcast %55 : vector<1x128xi32> to vector<128x128xi32>
      %57 = arith.cmpi eq, %10, %56 : vector<128x128xi32>
      %58 = arith.extui %57 : vector<128x128xi1> to vector<128x128xi32>
      %59 = arith.sitofp %58 : vector<128x128xi32> to vector<128x128xf32>
      %60 = arith.addf %53, %59 : vector<128x128xf32>
      %c7_i32 = arith.constant 7 : i32
      %61 = arith.index_cast %c7_i32 : i32 to index
      %c0_14 = arith.constant 0 : index
      %62 = vector.load %arg1[%61, %c0_14] : memref<16x128xi32, #tpu.memory_space<vmem>>, vector<1x128xi32>
      %63 = vector.broadcast %62 : vector<1x128xi32> to vector<128x128xi32>
      %64 = arith.cmpi eq, %10, %63 : vector<128x128xi32>
      %65 = arith.extui %64 : vector<128x128xi1> to vector<128x128xi32>
      %66 = arith.sitofp %65 : vector<128x128xi32> to vector<128x128xf32>
      %67 = arith.addf %60, %66 : vector<128x128xf32>
      %c8_i32 = arith.constant 8 : i32
      %68 = arith.index_cast %c8_i32 : i32 to index
      %c0_15 = arith.constant 0 : index
      %69 = vector.load %arg1[%68, %c0_15] : memref<16x128xi32, #tpu.memory_space<vmem>>, vector<1x128xi32>
      %70 = vector.broadcast %69 : vector<1x128xi32> to vector<128x128xi32>
      %71 = arith.cmpi eq, %10, %70 : vector<128x128xi32>
      %72 = arith.extui %71 : vector<128x128xi1> to vector<128x128xi32>
      %73 = arith.sitofp %72 : vector<128x128xi32> to vector<128x128xf32>
      %74 = arith.addf %67, %73 : vector<128x128xf32>
      %c9_i32 = arith.constant 9 : i32
      %75 = arith.index_cast %c9_i32 : i32 to index
      %c0_16 = arith.constant 0 : index
      %76 = vector.load %arg1[%75, %c0_16] : memref<16x128xi32, #tpu.memory_space<vmem>>, vector<1x128xi32>
      %77 = vector.broadcast %76 : vector<1x128xi32> to vector<128x128xi32>
      %78 = arith.cmpi eq, %10, %77 : vector<128x128xi32>
      %79 = arith.extui %78 : vector<128x128xi1> to vector<128x128xi32>
      %80 = arith.sitofp %79 : vector<128x128xi32> to vector<128x128xf32>
      %81 = arith.addf %74, %80 : vector<128x128xf32>
      %c10_i32 = arith.constant 10 : i32
      %82 = arith.index_cast %c10_i32 : i32 to index
      %c0_17 = arith.constant 0 : index
      %83 = vector.load %arg1[%82, %c0_17] : memref<16x128xi32, #tpu.memory_space<vmem>>, vector<1x128xi32>
      %84 = vector.broadcast %83 : vector<1x128xi32> to vector<128x128xi32>
      %85 = arith.cmpi eq, %10, %84 : vector<128x128xi32>
      %86 = arith.extui %85 : vector<128x128xi1> to vector<128x128xi32>
      %87 = arith.sitofp %86 : vector<128x128xi32> to vector<128x128xf32>
      %88 = arith.addf %81, %87 : vector<128x128xf32>
      %c11_i32 = arith.constant 11 : i32
      %89 = arith.index_cast %c11_i32 : i32 to index
      %c0_18 = arith.constant 0 : index
      %90 = vector.load %arg1[%89, %c0_18] : memref<16x128xi32, #tpu.memory_space<vmem>>, vector<1x128xi32>
      %91 = vector.broadcast %90 : vector<1x128xi32> to vector<128x128xi32>
      %92 = arith.cmpi eq, %10, %91 : vector<128x128xi32>
      %93 = arith.extui %92 : vector<128x128xi1> to vector<128x128xi32>
      %94 = arith.sitofp %93 : vector<128x128xi32> to vector<128x128xf32>
      %95 = arith.addf %88, %94 : vector<128x128xf32>
      %c12_i32 = arith.constant 12 : i32
      %96 = arith.index_cast %c12_i32 : i32 to index
      %c0_19 = arith.constant 0 : index
      %97 = vector.load %arg1[%96, %c0_19] : memref<16x128xi32, #tpu.memory_space<vmem>>, vector<1x128xi32>
      %98 = vector.broadcast %97 : vector<1x128xi32> to vector<128x128xi32>
      %99 = arith.cmpi eq, %10, %98 : vector<128x128xi32>
      %100 = arith.extui %99 : vector<128x128xi1> to vector<128x128xi32>
      %101 = arith.sitofp %100 : vector<128x128xi32> to vector<128x128xf32>
      %102 = arith.addf %95, %101 : vector<128x128xf32>
      %c13_i32 = arith.constant 13 : i32
      %103 = arith.index_cast %c13_i32 : i32 to index
      %c0_20 = arith.constant 0 : index
      %104 = vector.load %arg1[%103, %c0_20] : memref<16x128xi32, #tpu.memory_space<vmem>>, vector<1x128xi32>
      %105 = vector.broadcast %104 : vector<1x128xi32> to vector<128x128xi32>
      %106 = arith.cmpi eq, %10, %105 : vector<128x128xi32>
      %107 = arith.extui %106 : vector<128x128xi1> to vector<128x128xi32>
      %108 = arith.sitofp %107 : vector<128x128xi32> to vector<128x128xf32>
      %109 = arith.addf %102, %108 : vector<128x128xf32>
      %c14_i32 = arith.constant 14 : i32
      %110 = arith.index_cast %c14_i32 : i32 to index
      %c0_21 = arith.constant 0 : index
      %111 = vector.load %arg1[%110, %c0_21] : memref<16x128xi32, #tpu.memory_space<vmem>>, vector<1x128xi32>
      %112 = vector.broadcast %111 : vector<1x128xi32> to vector<128x128xi32>
      %113 = arith.cmpi eq, %10, %112 : vector<128x128xi32>
      %114 = arith.extui %113 : vector<128x128xi1> to vector<128x128xi32>
      %115 = arith.sitofp %114 : vector<128x128xi32> to vector<128x128xf32>
      %116 = arith.addf %109, %115 : vector<128x128xf32>
      %c15_i32 = arith.constant 15 : i32
      %117 = arith.index_cast %c15_i32 : i32 to index
      %c0_22 = arith.constant 0 : index
      %118 = vector.load %arg1[%117, %c0_22] : memref<16x128xi32, #tpu.memory_space<vmem>>, vector<1x128xi32>
      %119 = vector.broadcast %118 : vector<1x128xi32> to vector<128x128xi32>
      %120 = arith.cmpi eq, %10, %119 : vector<128x128xi32>
      %121 = arith.extui %120 : vector<128x128xi1> to vector<128x128xi32>
      %122 = arith.sitofp %121 : vector<128x128xi32> to vector<128x128xf32>
      %123 = arith.addf %116, %122 : vector<128x128xf32>
      %c16_i32 = arith.constant 16 : i32
      %124 = tpu.assume_multiple %8, 128 : i32
      %125 = arith.index_cast %124 : i32 to index
      %c0_23 = arith.constant 0 : index
      %126 = vector.load %arg2[%125, %c0_23] : memref<512x1xf32, #tpu.memory_space<vmem>>, vector<128x1xf32>
      %127 = vector.broadcast %126 : vector<128x1xf32> to vector<128x128xf32>
      %128 = arith.mulf %123, %127 : vector<128x128xf32>
      %cst_24 = arith.constant dense<0.000000e+00> : vector<128xf32>
      %129 = vector.multi_reduction <add>, %128, %cst_24 [0] : vector<128x128xf32> to vector<128xf32>
      %130 = vector.shape_cast %129 : vector<128xf32> to vector<1x128xf32>
      %131 = arith.addf %arg6, %130 : vector<1x128xf32>
      scf.yield %131 : vector<1x128xf32>
    }
    %c4_i32_0 = arith.constant 4 : i32
    %c0 = arith.constant 0 : index
    %4 = memref.load %arg3[%c0] : memref<1xf32, #tpu.memory_space<smem>>
    %5 = vector.broadcast %4 : f32 to vector<1x128xf32>
    %6 = arith.addf %3, %5 : vector<1x128xf32>
    %c0_1 = arith.constant 0 : index
    %c0_2 = arith.constant 0 : index
    %7 = vector.load %arg4[%c0_1, %c0_2] : memref<1x128xf32, #tpu.memory_space<vmem>>, vector<1x128xf32>
    tpu.vector_store %arg4[%c0_1, %c0_2], %6 {strides = array<i32>} : memref<1x128xf32, #tpu.memory_space<vmem>>, vector<1x128xf32>,
    return
  }
  func.func @transform_0(%arg0: i32) -> (i32, i32) {
    %c0_i32 = arith.constant 0 : i32
    %c0_i32_0 = arith.constant 0 : i32
    return %c0_i32, %arg0 : i32, i32
  }
  func.func @transform_1(%arg0: i32) -> (i32, i32) {
    %c0_i32 = arith.constant 0 : i32
    %c0_i32_0 = arith.constant 0 : i32
    %c0_i32_1 = arith.constant 0 : i32
    return %c0_i32, %c0_i32_0 : i32, i32
  }
  func.func @transform_2(%arg0: i32) -> i32 {
    %c0_i32 = arith.constant 0 : i32
    %c0_i32_0 = arith.constant 0 : i32
    return %c0_i32 : i32
  }
  func.func @transform_3(%arg0: i32) -> (i32, i32) {
    %c0_i32 = arith.constant 0 : i32
    %c0_i32_0 = arith.constant 0 : i32
    return %c0_i32, %arg0 : i32, i32
  }
}

</mosaic_0001>

<bundles_post_ra>
// kernel: tpu_custom_call.1
= control target key start
LH: loop header
LB: loop body
LE: loop exit
PB: predicated region body
PF: predicated region fallthrough
CT: control target
= control target key end

     0   :  { %s3385_s0 = inlined_call_operand.vmem [shape: s32[16,256], index: 0, kind: input, shape index: {}]   ;;  %s3386_s1 = inlined_call_operand.vmem [shape: f32[512,1], index: 1, kind: input, shape index: {}]   ;;  %s3387_s2 = inlined_call_operand.<no memory space> [shape: f32[1], index: 2, kind: input, shape index: {}]   ;;  %s3388_s3 = inlined_call_operand.hbm [shape: f32[1,256], index: 3, kind: output, shape index: {}]  }
   0x1   :  { %8 = sst [smem:[#allocation2]] %s3387_s2 }
   0x2   :  { %9 = vsyncpa [#allocation5], 0 }
   0x3   :  { %11 = vsyncpa [#allocation5 + $0x1], 0  ;;  %s2039_s14 = smov 0   ;;  %s2041_s15 = smov 0  }
   0x4   :  { %s2043_s16 = smov 0   ;;  %s2045_s17 = smov 0  }
   0x5 LB: > { %s1576_s2 = sadd.s32 4294967295, %s2003_s17   ;;  %s1577_s18 = sadd.s32 4294967294, %s2003_s17   ;;  %s2003_s17 = sphi %s2045_s17, %s3416_s17   ;;  %s1999_s16 = sphi %s2043_s16, %s3415_s16   ;;  %s1995_s15 = sphi %s2041_s15, %s3414_s15   ;;  %s1991_s14 = sphi %s2039_s14, %s3413_s14  }
   0x6   : > { %s2062_s19 = sadd.s32 1, %s2003_s17   ;;  %s24_s20 = sadd.s32 1, %s1999_s16 }
   0x7   : > { %s21_s21 = ssub.s32 %s2003_s17, %s2062_s19  ;;  %p31_p0 = scmp.ne.s32.totalorder %s1999_s16, %s1995_s15 }
   0x8   : > { %p22_p1 = scmp.eq.s32.totalorder %s21_s21, 0  ;;  %p32_p2 = scmp.eq.s32.totalorder %s2003_s17, 0 }
   0x9   : > { %p103_p3 = scmp.eq.s32.totalorder %s1576_s2, 1  ;;  %p108_p4 = scmp.ne.s32.totalorder %s1995_s15, %s1991_s14 }
   0xa   : > { %s2075_s22 = scalar_select %p22_p1, %s1999_s16, %s24_s20  }
   0xb   : > { %p33_p5 = por %p32_p2, %p31_p0  ;;  %p2077_p6 = por %p103_p3, %p31_p0 }
   0xc   : > { %p109_p7 = scmp.eq.s32.totalorder %s1577_s18, 1  ;;  %p3390_p9 = scmp.ge.s32.totalorder %s2003_s17, 2 }
   0xe   : > { %p2081_p8 = por %p109_p7, %p108_p4  ;;  %131 = sbr.rel (%p3390_p9) target bundleno = 24 (0x18), region = 24 }
  0x13   : > { %134 = sbr.rel (!%p33_p5) target bundleno = 24 (0x18), region = 28  ;;  %s136_s25 = sand.u32 (%p33_p5), 1, %s1999_s16  }
  0x14   : > { %s1581_s26 = sshll.u32 (%p33_p5), %s2003_s17, 3  ;;  %s1580_s27 = sshll.u32 (%p33_p5), %s136_s25, 4 }
  0x15   : > { %s140_s30 = scalar_lea.vmem (%p33_p5), %s3385_s0, %s1581_s26  ;;  %s138_s4 = scalar_lea.vmem (%p33_p5), [#allocation3], %s1580_s27 }
  0x16   : > { %v171_v0 = vld [vmem:[%s140_s30] sm:$0xff] (%p33_p5)  ;;  %v173_v1 = vld [vmem:[%s140_s30 + $0x10] sm:$0xff] (%p33_p5) }
  0x17   : > { %172 = vst [vmem:[%s138_s4] sm:$0xff] (%p33_p5), %v171_v0  ;;  %174 = vst [vmem:[%s138_s4 + $0x8] sm:$0xff] (%p33_p5), %v173_v1 }
  0x18 PF: > { %p1582_p10 = scmp.ge.s32.totalorder %s2003_s17, 1  ;;  %p179_p11 = scmp.lt.s32.totalorder %s2003_s17, 3 }
  0x1a   : > { %p180_p12 = pnand %p1582_p10, %p179_p11 }
  0x1c   : > { %183 = sbr.rel (%p180_p12) target bundleno = 289 (0x121), region = 66 }
  0x21   : > { %s2096_s5 = sand.u32 1, %s1995_s15   ;;  %v208_v2 = vlaneseq  ;;  %v2149_v19 = vmov 0.0   ;;  %s2151_s9 = smov 0  }
  0x22   : > { %s1583_s6 = sshll.u32 %s2096_s5, 4  ;;  %s207_s8 = scalar_lea.vmem [#allocation4], %s2096_s5 }
  0x23   : > { %v2099_v3 = vshrl.u32 %v208_v2, 7  ;;  %s2146_s7 = scalar_lea.vmem [#allocation3], %s1583_s6 }
  0x25   : > { %3393 = vst [vmem:[#allocation7_spill] sm:$0xff] %v2099_v3  ;;  %v2102_v4 = vadd.s32 8, %v2099_v3  ;;  %v2105_v5 = vadd.s32 16, %v2099_v3  ;;  %v2108_v6 = vadd.s32 24, %v2099_v3  ;;  %v2111_v7 = vadd.s32 32, %v2099_v3 }
  0x26   : > { %v2114_v8 = vadd.s32 40, %v2099_v3  ;;  %v2117_v9 = vadd.s32 48, %v2099_v3  ;;  %v2120_v10 = vadd.s32 56, %v2099_v3  ;;  %v2123_v11 = vadd.s32 64, %v2099_v3 }
  0x27   : > { %3394 = vst [vmem:[#allocation8_spill] sm:$0xff] %v2102_v4  ;;  %3395 = vst [vmem:[#allocation9_spill] sm:$0xff] %v2105_v5  ;;  %v2126_v12 = vadd.s32 72, %v2099_v3  ;;  %v2129_v13 = vadd.s32 80, %v2099_v3  ;;  %v2132_v14 = vadd.s32 88, %v2099_v3  ;;  %v2135_v15 = vadd.s32 96, %v2099_v3 }
  0x28   : > { %3396 = vst [vmem:[#allocation10_spill] sm:$0xff] %v2108_v6  ;;  %3397 = vst [vmem:[#allocation11_spill] sm:$0xff] %v2111_v7  ;;  %v2138_v16 = vadd.s32 104, %v2099_v3  ;;  %v2141_v17 = vadd.s32 112, %v2099_v3  ;;  %v2144_v18 = vadd.s32 120, %v2099_v3 }
  0x29   : > { %3398 = vst [vmem:[#allocation12_spill] sm:$0xff] %v2114_v8  ;;  %3399 = vst [vmem:[#allocation13_spill] sm:$0xff] %v2117_v9 }
  0x2a   : > { %3400 = vst [vmem:[#allocation14_spill] sm:$0xff] %v2120_v10  ;;  %3401 = vst [vmem:[#allocation15_spill] sm:$0xff] %v2123_v11 }
  0x2b LB: >> { %v2013_v20 = vmov 0   ;;  %s1584_s10 = sshll.u32 %s2011_s9, 7  ;;  %v2175_v26 = vld [vmem:[%s2146_s7] ss:$0 sm:$0xff]  ;;  %v2179_v28 = vld [vmem:[%s2146_s7 + $0x1] ss:$0 sm:$0xff]  ;;  %s2011_s9 = sphi %s2151_s9, %s230_s9   ;;  %v2007_v19 = vphi %v2149_v19, %v3411_v19  }
  0x2c   : >> { %1918 = vset.pattern.permute.xlu1 %v2013_v20  ;;  %1917 = vset.pattern.permute.xlu0 %v2013_v20  ;;  %s2163_s13 = scalar_lea.vmem %s3386_s1, %s1584_s10  ;;  %v2165_v21 = vstv %s1584_s10  ;;  %v2182_v29 = vld [vmem:[%s2146_s7 + $0x2] ss:$0 sm:$0xff]  ;;  %v2191_v30 = vld [vmem:[%s2146_s7 + $0x3] ss:$0 sm:$0xff]  ;;  %v2014_v31 = vmov 0.0   ;;  %s230_s9 = sadd.s32 1, %s2011_s9  }
  0x2d   : >> { %v1357_v22 = vld [vmem:[%s2163_s13 + $0x10] sm:$0xff]  ;;  %v1355_v24 = vld [vmem:[%s2163_s13] sm:$0xff]  ;;  %v1358_v25 = vld [vmem:[%s2163_s13 + $0x18] sm:$0xff]  ;;  %p227_p13 = scmp.ge.s32.totalorder %s230_s9, 4  }
  0x2e   : >> { %v3402_v5 = vld [vmem:[#allocation9_spill] sm:$0xff]  ;;  %1383 = vperm.xlu1 %1918, %v1357_v22   ;;  %1373 = vperm.xlu0 %1917, %v1355_v24   ;;  %v1356_v27 = vld [vmem:[%s2163_s13 + $0x8] sm:$0xff]  ;;  %v1359_v34 = vld [vmem:[%s2163_s13 + $0x20] sm:$0xff]  ;;  %s1489_s18 = sld [smem:[#allocation2]] (%p227_p13)  ;;  %s1857_s20 = sshll.u32 (%p227_p13), %s1576_s2, 4 }
  0x2f   : >> { %v2170_v23 = vadd.s32 %v2165_v21, %v3402_v5  ;;  %v1360_v33 = vld [vmem:[%s2163_s13 + $0x28] sm:$0xff]  ;;  %v2199_v35 = vld [vmem:[%s2146_s7 + $0x4] ss:$0 sm:$0xff]  ;;  %v1362_v41 = vld [vmem:[%s2163_s13 + $0x38] sm:$0xff]  ;;  %s1506_s21 = sshll.u32 (%p227_p13), %s207_s8, 4  ;;  %s1504_s27 = scalar_lea.hbm (%p227_p13), %s3388_s3, %s1857_s20  ;;  %s1507_s21 = int_to_ptr.vmem [resolvable:$true] %s1506_s21 }
  0x30   : >> { %v3403_v3 = vld [vmem:[#allocation7_spill] sm:$0xff]  ;;  %v1361_v43 = vld [vmem:[%s2163_s13 + $0x30] sm:$0xff]  ;;  %v3404_v6 = vld [vmem:[#allocation10_spill] sm:$0xff]  ;;  %s1494_s28 = scalar_lea.sflag (%p227_p13), [#allocation5], %s2096_s5  ;;  %s1935_s29 = scalar_lea.vmem (%p227_p13), %s1507_s21, 16 }
  0x31   : >> { %vm257_vm0 = vcmp.eq.s32.totalorder %v2170_v23, %v2175_v26  ;;  %vm326_vm1 = vcmp.eq.s32.totalorder %v2170_v23, %v2179_v28  ;;  %vm395_vm2 = vcmp.eq.s32.totalorder %v2170_v23, %v2182_v29  ;;  %vm464_vm3 = vcmp.eq.s32.totalorder %v2170_v23, %v2191_v30  ;;  %v2213_v44 = vld [vmem:[%s2146_s7 + $0x5] ss:$0 sm:$0xff]  ;;  %v1364_v48 = vld [vmem:[%s2163_s13 + $0x48] sm:$0xff]  ;;  %v2232_v53 = vld [vmem:[%s2146_s7 + $0x6] ss:$0 sm:$0xff]  ;;  %p1936_p0 = scmp.ne.s32.totalorder (%p227_p13), %s1507_s21, %s1935_s29  ;;  %s2015_s30 = smov (%p227_p13), [#allocation4]  }
  0x32   : >> { %1388 = vperm.xlu1 %1918, %v1358_v25   ;;  %v1588_v32 = vsel %vm257_vm0, 1.0, %v2014_v31  ;;  %1378 = vperm.xlu0 %1917, %v1356_v27   ;;  %v1605_v36 = vsel %vm326_vm1, 1.0, %v2014_v31  ;;  %v1622_v37 = vsel %vm395_vm2, 1.0, %v2014_v31  ;;  %v2205_v38 = vadd.s32 %v2165_v21, %v3403_v3  ;;  %v1363_v52 = vld [vmem:[%s2163_s13 + $0x40] sm:$0xff]  ;;  %v1366_v59 = vld [vmem:[%s2163_s13 + $0x58] sm:$0xff]  ;;  %v1365_v63 = vld [vmem:[%s2163_s13 + $0x50] sm:$0xff] }
  0x33   : >> { %v374_v39 = vadd.f32 %v1605_v36, %v1588_v32  ;;  %vm533_vm4 = vcmp.eq.s32.totalorder %v2170_v23, %v2199_v35  ;;  %v1639_v40 = vsel %vm464_vm3, 1.0, %v2014_v31  ;;  %vm602_vm5 = vcmp.eq.s32.totalorder %v2170_v23, %v2213_v44  ;;  %v2246_v60 = vld [vmem:[%s2146_s7 + $0x7] ss:$0 sm:$0xff]  ;;  %v3405_v4 = vld [vmem:[#allocation8_spill] sm:$0xff]  ;;  %v3409_v10 = vld [vmem:[#allocation14_spill] sm:$0xff]  ;;  %p1937_p1 = pnand (%p227_p13), %p1936_p0, %p2077_p6  ;;  %s1939_s4 = sshll.u32 (%p227_p13), %s2015_s30, 4  ;;  %s1940_s4 = int_to_ptr.vmem [resolvable:$false] %s1939_s4 }
  0x34   : >> { %v1656_v45 = vsel %vm533_vm4, 1.0, %v2014_v31  ;;  %vm255_vm6 = vcmp.eq.s32.totalorder %v2205_v38, %v2175_v26  ;;  %vm324_vm7 = vcmp.eq.s32.totalorder %v2205_v38, %v2179_v28  ;;  %vm393_vm8 = vcmp.eq.s32.totalorder %v2205_v38, %v2182_v29  ;;  %v3406_v7 = vld [vmem:[#allocation11_spill] sm:$0xff]  ;;  %v3407_v8 = vld [vmem:[#allocation12_spill] sm:$0xff]  ;;  %v3408_v9 = vld [vmem:[#allocation13_spill] sm:$0xff]  ;;  %s1941_s2 = scalar_lea.vmem (%p227_p13), %s1940_s4, 32  ;;  %p1942_p3 = scmp.lt.s32.totalorder (%p227_p13), %s1507_s21, %s1940_s4 }
  0x35   : >> { %v443_v42 = vadd.f32 %v1622_v37, %v374_v39  ;;  %v1586_v47 = vsel %vm255_vm6, 1.0, %v2014_v31  ;;  %vm462_vm9 = vcmp.eq.s32.totalorder %v2205_v38, %v2191_v30  ;;  %v1603_v50 = vsel %vm324_vm7, 1.0, %v2014_v31  ;;  %v3410_v11 = vld [vmem:[#allocation15_spill] sm:$0xff]  ;;  %p1938_p2 = pneg (%p227_p13), %p1937_p1  ;;  %p1943_p4 = scmp.lt.s32.totalorder (%p227_p13), %s1941_s2, %s1935_s29 }
  0x36   : >> { %1398 = vperm.xlu1 %1918, %v1360_v33   ;;  %1393 = vperm.xlu0 %1917, %v1359_v34   ;;  %v1620_v51 = vsel %vm393_vm8, 1.0, %v2014_v31  ;;  %v1673_v54 = vsel %vm602_vm5, 1.0, %v2014_v31  ;;  %v372_v55 = vadd.f32 %v1603_v50, %v1586_v47  ;;  %vm531_vm10 = vcmp.eq.s32.totalorder %v2205_v38, %v2199_v35  ;;  %v1368_v36 = vld [vmem:[%s2163_s13 + $0x68] sm:$0xff] }
  0x37   : >> { %v512_v46 = vadd.f32 %v1639_v40, %v443_v42  ;;  %vm671_vm11 = vcmp.eq.s32.totalorder %v2170_v23, %v2232_v53  ;;  %v1637_v56 = vsel %vm462_vm9, 1.0, %v2014_v31  ;;  %v2242_v58 = vadd.s32 %v2165_v21, %v3404_v6  ;;  %v2295_v42 = vld [vmem:[%s2146_s7 + $0x8] ss:$0 sm:$0xff]  ;;  %p1944_p5 = por (%p227_p13), %p1943_p4, %p1942_p3 }
  0x38   : >> { %v441_v57 = vadd.f32 %v1620_v51, %v372_v55  ;;  %v1654_v62 = vsel %vm531_vm10, 1.0, %v2014_v31  ;;  %v1690_v0 = vsel %vm671_vm11, 1.0, %v2014_v31  ;;  %vm740_vm12 = vcmp.eq.s32.totalorder %v2170_v23, %v2246_v60 }
  0x39   : >> { %v581_v49 = vadd.f32 %v1656_v45, %v512_v46  ;;  %vm600_vm13 = vcmp.eq.s32.totalorder %v2205_v38, %v2213_v44  ;;  %v2257_v2 = vadd.s32 %v2165_v21, %v3405_v4  ;;  %v2261_v20 = vadd.s32 %v2165_v21, %v3406_v7  ;;  %p1945_p7 = pnand (%p227_p13), %p1944_p5, %p1938_p2 }
  0x3a   : >> { %1408 = vperm.xlu1 %1918, %v1362_v41   ;;  %1403 = vperm.xlu0 %1917, %v1361_v43   ;;  %v510_v1 = vadd.f32 %v1637_v56, %v441_v57  ;;  %v2265_v22 = vadd.s32 %v2165_v21, %v3407_v8  ;;  %v2269_v24 = vadd.s32 %v2165_v21, %v3408_v9  ;;  %v1707_v39 = vsel %vm740_vm12, 1.0, %v2014_v31  ;;  %v1367_v41 = vld [vmem:[%s2163_s13 + $0x60] sm:$0xff]  ;;  %v1369_v57 = vld [vmem:[%s2163_s13 + $0x70] sm:$0xff] }
  0x3b   : >> { %v650_v61 = vadd.f32 %v1673_v54, %v581_v49  ;;  %v2273_v25 = vadd.s32 %v2165_v21, %v3409_v10  ;;  %v2277_v27 = vadd.s32 %v2165_v21, %v3410_v11  ;;  %v2281_v32 = vadd.s32 %v2165_v21, %v2126_v12 }
  0x3c   : >> { %v579_v33 = vadd.f32 %v1654_v62, %v510_v1  ;;  %v2285_v34 = vadd.s32 %v2165_v21, %v2129_v13  ;;  %v1671_v40 = vsel %vm600_vm13, 1.0, %v2014_v31  ;;  %vm669_vm14 = vcmp.eq.s32.totalorder %v2205_v38, %v2232_v53  ;;  %v2353_v1 = vld [vmem:[%s2146_s7 + $0xb] ss:$0 sm:$0xff] }
  0x3d   : >> { %v719_v37 = vadd.f32 %v1690_v0, %v650_v61  ;;  %vm258_vm15 = vcmp.eq.s32.totalorder %v2242_v58, %v2175_v26  ;;  %vm327_vm0 = vcmp.eq.s32.totalorder %v2242_v58, %v2179_v28  ;;  %vm396_vm1 = vcmp.eq.s32.totalorder %v2242_v58, %v2182_v29 }
  0x3e   : >> { %1418 = vperm.xlu1 %1918, %v1364_v48   ;;  %1413 = vperm.xlu0 %1917, %v1363_v52   ;;  %vm809_vm2 = vcmp.eq.s32.totalorder %v2170_v23, %v2295_v42  ;;  %v1589_v43 = vsel %vm258_vm15, 1.0, %v2014_v31  ;;  %v1606_v45 = vsel %vm327_vm0, 1.0, %v2014_v31  ;;  %v1623_v46 = vsel %vm396_vm1, 1.0, %v2014_v31  ;;  %v2315_v48 = vld [vmem:[%s2146_s7 + $0x9] ss:$0 sm:$0xff] }
  0x3f   : >> { %v2312_v47 = vadd.s32 %v2165_v21, %v2132_v14  ;;  %v648_v49 = vadd.f32 %v1671_v40, %v579_v33  ;;  %v375_v50 = vadd.f32 %v1606_v45, %v1589_v43  ;;  %vm465_vm3 = vcmp.eq.s32.totalorder %v2242_v58, %v2191_v30  ;;  %v1370_v52 = vld [vmem:[%s2163_s13 + $0x78] sm:$0xff] }
  0x40   : >> { %v2321_v51 = vadd.s32 %v2165_v21, %v2135_v15  ;;  %v788_v54 = vadd.f32 %v1707_v39, %v719_v37  ;;  %vm878_vm4 = vcmp.eq.s32.totalorder %v2170_v23, %v2315_v48  ;;  %v1688_v55 = vsel %vm669_vm14, 1.0, %v2014_v31  ;;  %v2365_v37 = vld [vmem:[%s2146_s7 + $0xd] ss:$0 sm:$0xff]  ;;  %v2376_v40 = vld [vmem:[%s2146_s7 + $0xe] ss:$0 sm:$0xff] }
  0x41   : >> { %v2332_v56 = vadd.s32 %v2165_v21, %v2138_v16  ;;  %v1724_v61 = vsel %vm809_vm2, 1.0, %v2014_v31  ;;  %vm738_vm5 = vcmp.eq.s32.totalorder %v2205_v38, %v2246_v60  ;;  %v444_v62 = vadd.f32 %v1623_v46, %v375_v50  ;;  %v2387_v45 = vld [vmem:[%s2146_s7 + $0xf] ss:$0 sm:$0xff] }
  0x42   : >> { %1428 = vperm.xlu1 %1918, %v1366_v59   ;;  %1423 = vperm.xlu0 %1917, %v1365_v63   ;;  %v2336_v59 = vld [vmem:[%s2146_s7 + $0xa] ss:$0 sm:$0xff]  ;;  %v2346_v63 = vadd.s32 %v2165_v21, %v2141_v17  ;;  %v2350_v0 = vadd.s32 %v2165_v21, %v2144_v18  ;;  %v1640_v33 = vsel %vm465_vm3, 1.0, %v2014_v31  ;;  %v1741_v21 = vsel %vm878_vm4, 1.0, %v2014_v31 }
  0x43   : >> { %vm947_vm6 = vcmp.eq.s32.totalorder %v2170_v23, %v2336_v59  ;;  %vm1016_vm7 = vcmp.eq.s32.totalorder %v2170_v23, %v2353_v1  ;;  %v717_v39 = vadd.f32 %v1688_v55, %v648_v49  ;;  %vm534_vm8 = vcmp.eq.s32.totalorder %v2242_v58, %v2199_v35 }
  0x44   : >> { %vm1154_vm10 = vcmp.eq.s32.totalorder %v2170_v23, %v2365_v37  ;;  %v1705_v43 = vsel %vm738_vm5, 1.0, %v2014_v31  ;;  %v1758_v46 = vsel %vm947_vm6, 1.0, %v2014_v31  ;;  %vm1223_vm11 = vcmp.eq.s32.totalorder %v2170_v23, %v2376_v40 }
  0x45   : >> { %vm807_vm12 = vcmp.eq.s32.totalorder %v2205_v38, %v2295_v42  ;;  %v513_v49 = vadd.f32 %v1640_v33, %v444_v62  ;;  %v1775_v50 = vsel %vm1016_vm7, 1.0, %v2014_v31  ;;  %vm1292_vm13 = vcmp.eq.s32.totalorder %v2170_v23, %v2387_v45 }
  0x46   : >> { %1438 = vperm.xlu1 %1918, %v1368_v36   ;;  %1433 = vperm.xlu0 %1917, %v1367_v41   ;;  %v2362_v36 = vld [vmem:[%s2146_s7 + $0xc] ss:$0 sm:$0xff]  ;;  %v857_v41 = vadd.f32 %v1724_v61, %v788_v54  ;;  %vm876_vm14 = vcmp.eq.s32.totalorder %v2205_v38, %v2315_v48  ;;  %v2405_v55 = vsel %vm1154_vm10, 1.0, %v2014_v31  ;;  %vm603_vm15 = vcmp.eq.s32.totalorder %v2242_v58, %v2213_v44 }
  0x47   : >> { %vm1085_vm9 = vcmp.eq.s32.totalorder %v2170_v23, %v2362_v36  ;;  %v2410_v62 = vsel %vm1223_vm11, 1.0, %v2014_v31  ;;  %v1722_v23 = vsel %vm807_vm12, 1.0, %v2014_v31  ;;  %vm256_vm0 = vcmp.eq.s32.totalorder %v2257_v2, %v2175_v26 }
  0x48   : >> { %v1792_v54 = vsel %vm1085_vm9, 1.0, %v2014_v31  ;;  %v926_v61 = vadd.f32 %v1741_v21, %v857_v41  ;;  %v2416_v33 = vsel %vm1292_vm13, 1.0, %v2014_v31  ;;  %v1739_v3 = vsel %vm876_vm14, 1.0, %v2014_v31 }
  0x49   : >> { %vm945_vm1 = vcmp.eq.s32.totalorder %v2205_v38, %v2336_v59  ;;  %v1587_v21 = vsel %vm256_vm0, 1.0, %v2014_v31  ;;  %vm325_vm2 = vcmp.eq.s32.totalorder %v2257_v2, %v2179_v28  ;;  %vm394_vm3 = vcmp.eq.s32.totalorder %v2257_v2, %v2182_v29 }
  0x4a   : >> { %1448 = vperm.xlu1 %1918, %v1370_v52   ;;  %1443 = vperm.xlu0 %1917, %v1369_v57   ;;  %v1657_v52 = vsel %vm534_vm8, 1.0, %v2014_v31  ;;  %v786_v57 = vadd.f32 %v1705_v43, %v717_v39  ;;  %v1674_v43 = vsel %vm603_vm15, 1.0, %v2014_v31  ;;  %vm672_vm4 = vcmp.eq.s32.totalorder %v2242_v58, %v2232_v53 }
  0x4b   : >> { %v582_v39 = vadd.f32 %v1657_v52, %v513_v49  ;;  %v1604_v4 = vsel %vm325_vm2, 1.0, %v2014_v31  ;;  %v1621_v5 = vsel %vm394_vm3, 1.0, %v2014_v31  ;;  %v995_v6 = vadd.f32 %v1758_v46, %v926_v61 }
  0x4c   : >> { %v855_v41 = vadd.f32 %v1722_v23, %v786_v57  ;;  %v373_v49 = vadd.f32 %v1604_v4, %v1587_v21  ;;  %vm463_vm5 = vcmp.eq.s32.totalorder %v2257_v2, %v2191_v30  ;;  %vm532_vm6 = vcmp.eq.s32.totalorder %v2257_v2, %v2199_v35 }
  0x4d   : >> { %vm1014_vm7 = vcmp.eq.s32.totalorder %v2205_v38, %v2353_v1  ;;  %vm1083_vm8 = vcmp.eq.s32.totalorder %v2205_v38, %v2362_v36  ;;  %v651_v52 = vadd.f32 %v1674_v43, %v582_v39  ;;  %v1638_v57 = vsel %vm463_vm5, 1.0, %v2014_v31 }
  0x4e   : >> { %v1756_v4 = vsel %vm945_vm1, 1.0, %v2014_v31  ;;  %v1691_v46 = vsel %vm672_vm4, 1.0, %v2014_v31  ;;  %v442_v61 = vadd.f32 %v1621_v5, %v373_v49  ;;  %vm601_vm9 = vcmp.eq.s32.totalorder %v2257_v2, %v2213_v44 }
  0x4f   : >> { %v924_v23 = vadd.f32 %v1739_v3, %v855_v41  ;;  %vm1152_vm10 = vcmp.eq.s32.totalorder %v2205_v38, %v2365_v37  ;;  %vm741_vm11 = vcmp.eq.s32.totalorder %v2242_v58, %v2246_v60  ;;  %v1655_v39 = vsel %vm532_vm6, 1.0, %v2014_v31 }
  0x50   : >> { %v1064_v43 = vadd.f32 %v1775_v50, %v995_v6  ;;  %vm1221_vm12 = vcmp.eq.s32.totalorder %v2205_v38, %v2376_v40  ;;  %vm1290_vm13 = vcmp.eq.s32.totalorder %v2205_v38, %v2387_v45  ;;  %v511_v5 = vadd.f32 %v1638_v57, %v442_v61 }
  0x51   : >> { %v1773_v3 = vsel %vm1014_vm7, 1.0, %v2014_v31  ;;  %v720_v21 = vadd.f32 %v1691_v46, %v651_v52  ;;  %vm810_vm14 = vcmp.eq.s32.totalorder %v2242_v58, %v2295_v42  ;;  %v1672_v41 = vsel %vm601_vm9, 1.0, %v2014_v31 }
  0x52   : >> { %v1790_v6 = vsel %vm1083_vm8, 1.0, %v2014_v31  ;;  %v1708_v50 = vsel %vm741_vm11, 1.0, %v2014_v31  ;;  %v580_v49 = vadd.f32 %v1655_v39, %v511_v5  ;;  %vm670_vm15 = vcmp.eq.s32.totalorder %v2257_v2, %v2232_v53 }
  0x53   : >> { %v993_v57 = vadd.f32 %v1756_v4, %v924_v23  ;;  %v1807_v52 = vsel %vm1152_vm10, 1.0, %v2014_v31  ;;  %v2475_v46 = vsel %vm1221_vm12, 1.0, %v2014_v31  ;;  %v2478_v61 = vsel %vm1290_vm13, 1.0, %v2014_v31 }
  0x54   : >> { %v1133_v7 = vadd.f32 %v1792_v54, %v1064_v43  ;;  %v1725_v8 = vsel %vm810_vm14, 1.0, %v2014_v31  ;;  %vm879_vm0 = vcmp.eq.s32.totalorder %v2242_v58, %v2315_v48  ;;  %v649_v39 = vadd.f32 %v1672_v41, %v580_v49 }
  0x55   : >> { %v789_v5 = vadd.f32 %v1708_v50, %v720_v21  ;;  %vm948_vm1 = vcmp.eq.s32.totalorder %v2242_v58, %v2336_v59  ;;  %v1689_v38 = vsel %vm670_vm15, 1.0, %v2014_v31  ;;  %vm260_vm2 = vcmp.eq.s32.totalorder %v2265_v22, %v2175_v26 }
  0x56   : >> { %vm739_vm3 = vcmp.eq.s32.totalorder %v2257_v2, %v2246_v60  ;;  %v1591_v54 = vsel %vm260_vm2, 1.0, %v2014_v31  ;;  %vm329_vm4 = vcmp.eq.s32.totalorder %v2265_v22, %v2179_v28  ;;  %vm398_vm5 = vcmp.eq.s32.totalorder %v2265_v22, %v2182_v29 }
  0x57   : >> { %v1062_v4 = vadd.f32 %v1773_v3, %v993_v57  ;;  %v1608_v23 = vsel %vm329_vm4, 1.0, %v2014_v31  ;;  %v1625_v43 = vsel %vm398_vm5, 1.0, %v2014_v31  ;;  %vm467_vm6 = vcmp.eq.s32.totalorder %v2265_v22, %v2191_v30 }
  0x58   : >> { %vm1017_vm7 = vcmp.eq.s32.totalorder %v2242_v58, %v2353_v1  ;;  %v718_v21 = vadd.f32 %v1689_v38, %v649_v39  ;;  %v377_v41 = vadd.f32 %v1608_v23, %v1591_v54  ;;  %vm536_vm8 = vcmp.eq.s32.totalorder %v2265_v22, %v2199_v35 }
  0x59   : >> { %v1742_v3 = vsel %vm879_vm0, 1.0, %v2014_v31  ;;  %v1759_v50 = vsel %vm948_vm1, 1.0, %v2014_v31  ;;  %v1706_v49 = vsel %vm739_vm3, 1.0, %v2014_v31  ;;  %v1642_v57 = vsel %vm467_vm6, 1.0, %v2014_v31 }
  0x5a   : >> { %v858_v9 = vadd.f32 %v1725_v8, %v789_v5  ;;  %vm808_vm9 = vcmp.eq.s32.totalorder %v2257_v2, %v2295_v42  ;;  %v446_v39 = vadd.f32 %v1625_v43, %v377_v41  ;;  %vm605_vm10 = vcmp.eq.s32.totalorder %v2265_v22, %v2213_v44 }
  0x5b   : >> { %v1202_v38 = vadd.f32 %v2405_v55, %v1133_v7  ;;  %v1131_v54 = vadd.f32 %v1790_v6, %v1062_v4  ;;  %vm1086_vm11 = vcmp.eq.s32.totalorder %v2242_v58, %v2362_v36  ;;  %v1659_v23 = vsel %vm536_vm8, 1.0, %v2014_v31 }
  0x5c   : >> { %v1776_v8 = vsel %vm1017_vm7, 1.0, %v2014_v31  ;;  %v787_v5 = vadd.f32 %v1706_v49, %v718_v21  ;;  %v515_v10 = vadd.f32 %v1642_v57, %v446_v39  ;;  %vm674_vm12 = vcmp.eq.s32.totalorder %v2265_v22, %v2232_v53 }
  0x5d   : >> { %vm1155_vm13 = vcmp.eq.s32.totalorder %v2242_v58, %v2365_v37  ;;  %v1723_v7 = vsel %vm808_vm9, 1.0, %v2014_v31  ;;  %vm877_vm14 = vcmp.eq.s32.totalorder %v2257_v2, %v2315_v48  ;;  %v1676_v55 = vsel %vm605_vm10, 1.0, %v2014_v31 }
  0x5e   : >> { %v927_v6 = vadd.f32 %v1742_v3, %v858_v9  ;;  %v1793_v4 = vsel %vm1086_vm11, 1.0, %v2014_v31  ;;  %v584_v43 = vadd.f32 %v1659_v23, %v515_v10  ;;  %vm743_vm15 = vcmp.eq.s32.totalorder %v2265_v22, %v2246_v60 }
  0x5f   : >> { %v1271_v21 = vadd.f32 %v2410_v62, %v1202_v38  ;;  %v1200_v41 = vadd.f32 %v1807_v52, %v1131_v54  ;;  %vm946_vm0 = vcmp.eq.s32.totalorder %v2257_v2, %v2336_v59  ;;  %v1693_v49 = vsel %vm674_vm12, 1.0, %v2014_v31 }
  0x60   : >> { %v856_v57 = vadd.f32 %v1723_v7, %v787_v5  ;;  %v1740_v39 = vsel %vm877_vm14, 1.0, %v2014_v31  ;;  %v653_v11 = vadd.f32 %v1676_v55, %v584_v43  ;;  %vm812_vm1 = vcmp.eq.s32.totalorder %v2265_v22, %v2295_v42 }
  0x61   : >> { %v1710_v9 = vsel %vm743_vm15, 1.0, %v2014_v31  ;;  %vm259_vm2 = vcmp.eq.s32.totalorder %v2261_v20, %v2175_v26  ;;  %vm328_vm3 = vcmp.eq.s32.totalorder %v2261_v20, %v2179_v28  ;;  %vm397_vm4 = vcmp.eq.s32.totalorder %v2261_v20, %v2182_v29 }
  0x62   : >> { %v996_v10 = vadd.f32 %v1759_v50, %v927_v6  ;;  %v722_v62 = vadd.f32 %v1693_v49, %v653_v11  ;;  %v1590_v52 = vsel %vm259_vm2, 1.0, %v2014_v31  ;;  %v1607_v3 = vsel %vm328_vm3, 1.0, %v2014_v31 }
  0x63   : >> { %vm1224_vm5 = vcmp.eq.s32.totalorder %v2242_v58, %v2376_v40  ;;  %v376_v38 = vadd.f32 %v1607_v3, %v1590_v52  ;;  %v1624_v54 = vsel %vm397_vm4, 1.0, %v2014_v31  ;;  %vm466_vm6 = vcmp.eq.s32.totalorder %v2261_v20, %v2191_v30 }
  0x64   : >> { %v925_v23 = vadd.f32 %v1740_v39, %v856_v57  ;;  %v791_v5 = vadd.f32 %v1710_v9, %v722_v62  ;;  %v1727_v7 = vsel %vm812_vm1, 1.0, %v2014_v31  ;;  %v1641_v50 = vsel %vm466_vm6, 1.0, %v2014_v31 }
  0x65   : >> { %v1757_v11 = vsel %vm946_vm0, 1.0, %v2014_v31  ;;  %vm881_vm7 = vcmp.eq.s32.totalorder %v2265_v22, %v2315_v48  ;;  %v445_v55 = vadd.f32 %v1624_v54, %v376_v38  ;;  %vm535_vm8 = vcmp.eq.s32.totalorder %v2261_v20, %v2199_v35 }
  0x66   : >> { %v1269_v6 = vadd.f32 %v2475_v46, %v1200_v41  ;;  %v1065_v43 = vadd.f32 %v1776_v8, %v996_v10  ;;  %vm1293_vm9 = vcmp.eq.s32.totalorder %v2242_v58, %v2387_v45  ;;  %vm1015_vm10 = vcmp.eq.s32.totalorder %v2257_v2, %v2353_v1 }
  0x67   : >> { %v1810_v49 = vsel %vm1155_vm13, 1.0, %v2014_v31  ;;  %vm1084_vm11 = vcmp.eq.s32.totalorder %v2257_v2, %v2362_v36  ;;  %v860_v57 = vadd.f32 %v1727_v7, %v791_v5  ;;  %v514_v39 = vadd.f32 %v1641_v50, %v445_v55 }
  0x68   : >> { %v1827_v46 = vsel %vm1224_vm5, 1.0, %v2014_v31  ;;  %v994_v8 = vadd.f32 %v1757_v11, %v925_v23  ;;  %v1744_v41 = vsel %vm881_vm7, 1.0, %v2014_v31  ;;  %v1658_v9 = vsel %vm535_vm8, 1.0, %v2014_v31 }
  0x69   : >> { %v1844_v10 = vsel %vm1293_vm9, 1.0, %v2014_v31  ;;  %v1774_v62 = vsel %vm1015_vm10, 1.0, %v2014_v31  ;;  %vm950_vm12 = vcmp.eq.s32.totalorder %v2265_v22, %v2336_v59  ;;  %vm604_vm13 = vcmp.eq.s32.totalorder %v2261_v20, %v2213_v44 }
  0x6a   : >> { %v2591_v52 = vadd.f32 %v2416_v33, %v1271_v21  ;;  %v2594_v58 = vadd.f32 %v2478_v61, %v1269_v6  ;;  %v1134_v3 = vadd.f32 %v1793_v4, %v1065_v43  ;;  %v1791_v38 = vsel %vm1084_vm11, 1.0, %v2014_v31 }
  0x6b   : >> { %vm1153_vm14 = vcmp.eq.s32.totalorder %v2257_v2, %v2365_v37  ;;  %vm1222_vm15 = vcmp.eq.s32.totalorder %v2257_v2, %v2376_v40  ;;  %v929_v54 = vadd.f32 %v1744_v41, %v860_v57  ;;  %v583_v23 = vadd.f32 %v1658_v9, %v514_v39 }
  0x6c   : >> { %v1063_v5 = vadd.f32 %v1774_v62, %v994_v8  ;;  %v1761_v7 = vsel %vm950_vm12, 1.0, %v2014_v31  ;;  %vm1019_vm0 = vcmp.eq.s32.totalorder %v2265_v22, %v2353_v1  ;;  %v1675_v33 = vsel %vm604_vm13, 1.0, %v2014_v31 }
  0x6d   : >> { %vm673_vm1 = vcmp.eq.s32.totalorder %v2261_v20, %v2232_v53  ;;  %vm262_vm2 = vcmp.eq.s32.totalorder %v2273_v25, %v2175_v26  ;;  %vm331_vm3 = vcmp.eq.s32.totalorder %v2273_v25, %v2179_v28  ;;  %vm400_vm4 = vcmp.eq.s32.totalorder %v2273_v25, %v2182_v29 }
  0x6e   : >> { %v1203_v61 = vadd.f32 %v1810_v49, %v1134_v3  ;;  %v1593_v4 = vsel %vm262_vm2, 1.0, %v2014_v31  ;;  %v1610_v21 = vsel %vm331_vm3, 1.0, %v2014_v31  ;;  %v1627_v50 = vsel %vm400_vm4, 1.0, %v2014_v31 }
  0x6f   : >> { %v998_v11 = vadd.f32 %v1761_v7, %v929_v54  ;;  %v652_v55 = vadd.f32 %v1675_v33, %v583_v23  ;;  %v379_v6 = vadd.f32 %v1610_v21, %v1593_v4  ;;  %vm469_vm5 = vcmp.eq.s32.totalorder %v2273_v25, %v2191_v30 }
  0x70   : >> { %v1808_v43 = vsel %vm1153_vm14, 1.0, %v2014_v31  ;;  %v1778_v57 = vsel %vm1019_vm0, 1.0, %v2014_v31  ;;  %vm1088_vm6 = vcmp.eq.s32.totalorder %v2265_v22, %v2362_v36  ;;  %v1692_v49 = vsel %vm673_vm1, 1.0, %v2014_v31 }
  0x71   : >> { %v1132_v39 = vadd.f32 %v1791_v38, %v1063_v5  ;;  %vm742_vm7 = vcmp.eq.s32.totalorder %v2261_v20, %v2246_v60  ;;  %v448_v8 = vadd.f32 %v1627_v50, %v379_v6  ;;  %v1644_v41 = vsel %vm469_vm5, 1.0, %v2014_v31 }
  0x72   : >> { %v1272_v9 = vadd.f32 %v1827_v46, %v1203_v61  ;;  %v1825_v62 = vsel %vm1222_vm15, 1.0, %v2014_v31  ;;  %vm1291_vm8 = vcmp.eq.s32.totalorder %v2257_v2, %v2387_v45  ;;  %vm538_vm9 = vcmp.eq.s32.totalorder %v2273_v25, %v2199_v35 }
  0x73   : >> { %v1067_v3 = vadd.f32 %v1778_v57, %v998_v11  ;;  %v1795_v38 = vsel %vm1088_vm6, 1.0, %v2014_v31  ;;  %vm1157_vm10 = vcmp.eq.s32.totalorder %v2265_v22, %v2365_v37  ;;  %v721_v54 = vadd.f32 %v1692_v49, %v652_v55 }
  0x74   : >> { %vm1226_vm11 = vcmp.eq.s32.totalorder %v2265_v22, %v2376_v40  ;;  %vm1295_vm12 = vcmp.eq.s32.totalorder %v2265_v22, %v2387_v45  ;;  %v1709_v46 = vsel %vm742_vm7, 1.0, %v2014_v31  ;;  %v517_v23 = vadd.f32 %v1644_v41, %v448_v8 }
  0x75   : >> { %v1201_v2 = vadd.f32 %v1808_v43, %v1132_v39  ;;  %v1842_v5 = vsel %vm1291_vm8, 1.0, %v2014_v31  ;;  %vm811_vm13 = vcmp.eq.s32.totalorder %v2261_v20, %v2295_v42  ;;  %v1661_v7 = vsel %vm538_vm9, 1.0, %v2014_v31 }
  0x76   : >> { %v2649_v33 = vadd.f32 %v1844_v10, %v1272_v9  ;;  %v1812_v61 = vsel %vm1157_vm10, 1.0, %v2014_v31  ;;  %vm880_vm14 = vcmp.eq.s32.totalorder %v2261_v20, %v2315_v48  ;;  %vm607_vm15 = vcmp.eq.s32.totalorder %v2273_v25, %v2213_v44 }
  0x77   : >> { %v1136_v22 = vadd.f32 %v1795_v38, %v1067_v3  ;;  %v1829_v4 = vsel %vm1226_vm11, 1.0, %v2014_v31  ;;  %v1846_v21 = vsel %vm1295_vm12, 1.0, %v2014_v31  ;;  %v790_v50 = vadd.f32 %v1709_v46, %v721_v54 }
  0x78   : >> { %v1726_v11 = vsel %vm811_vm13, 1.0, %v2014_v31  ;;  %v586_v55 = vadd.f32 %v1661_v7, %v517_v23  ;;  %vm261_vm0 = vcmp.eq.s32.totalorder %v2269_v24, %v2175_v26  ;;  %vm330_vm1 = vcmp.eq.s32.totalorder %v2269_v24, %v2179_v28 }
  0x79   : >> { %v1270_v10 = vadd.f32 %v1825_v62, %v1201_v2  ;;  %v1743_v6 = vsel %vm880_vm14, 1.0, %v2014_v31  ;;  %v1678_v43 = vsel %vm607_vm15, 1.0, %v2014_v31  ;;  %v1592_v57 = vsel %vm261_vm0, 1.0, %v2014_v31 }
  0x7a   : >> { %vm676_vm2 = vcmp.eq.s32.totalorder %v2273_v25, %v2232_v53  ;;  %v1609_v49 = vsel %vm330_vm1, 1.0, %v2014_v31  ;;  %vm399_vm3 = vcmp.eq.s32.totalorder %v2269_v24, %v2182_v29  ;;  %vm468_vm4 = vcmp.eq.s32.totalorder %v2269_v24, %v2191_v30 }
  0x7b   : >> { %v1205_v39 = vadd.f32 %v1812_v61, %v1136_v22  ;;  %v859_v8 = vadd.f32 %v1726_v11, %v790_v50  ;;  %v378_v41 = vadd.f32 %v1609_v49, %v1592_v57  ;;  %v1626_v9 = vsel %vm399_vm3, 1.0, %v2014_v31 }
  0x7c   : >> { %vm949_vm5 = vcmp.eq.s32.totalorder %v2261_v20, %v2336_v59  ;;  %vm1018_vm6 = vcmp.eq.s32.totalorder %v2261_v20, %v2353_v1  ;;  %v655_v62 = vadd.f32 %v1678_v43, %v586_v55  ;;  %v1643_v3 = vsel %vm468_vm4, 1.0, %v2014_v31 }
  0x7d   : >> { %vm1087_vm7 = vcmp.eq.s32.totalorder %v2261_v20, %v2362_v36  ;;  %v1695_v38 = vsel %vm676_vm2, 1.0, %v2014_v31  ;;  %v447_v54 = vadd.f32 %v1626_v9, %v378_v41  ;;  %vm537_vm8 = vcmp.eq.s32.totalorder %v2269_v24, %v2199_v35 }
  0x7e   : >> { %vm1156_vm9 = vcmp.eq.s32.totalorder %v2261_v20, %v2365_v37  ;;  %vm1225_vm10 = vcmp.eq.s32.totalorder %v2261_v20, %v2376_v40  ;;  %vm1294_vm11 = vcmp.eq.s32.totalorder %v2261_v20, %v2387_v45  ;;  %vm745_vm12 = vcmp.eq.s32.totalorder %v2273_v25, %v2246_v60 }
  0x7f   : >> { %v1274_v46 = vadd.f32 %v1829_v4, %v1205_v39  ;;  %v928_v23 = vadd.f32 %v1743_v6, %v859_v8  ;;  %vm814_vm13 = vcmp.eq.s32.totalorder %v2273_v25, %v2295_v42  ;;  %v516_v2 = vadd.f32 %v1643_v3, %v447_v54 }
  0x80   : >> { %v2694_v7 = vadd.f32 %v1842_v5, %v1270_v10  ;;  %v1760_v61 = vsel %vm949_vm5, 1.0, %v2014_v31  ;;  %v724_v22 = vadd.f32 %v1695_v38, %v655_v62  ;;  %v1660_v50 = vsel %vm537_vm8, 1.0, %v2014_v31 }
  0x81   : >> { %v1777_v4 = vsel %vm1018_vm6, 1.0, %v2014_v31  ;;  %v1794_v11 = vsel %vm1087_vm7, 1.0, %v2014_v31  ;;  %v1712_v5 = vsel %vm745_vm12, 1.0, %v2014_v31  ;;  %vm606_vm14 = vcmp.eq.s32.totalorder %v2269_v24, %v2213_v44 }
  0x82   : >> { %v1811_v55 = vsel %vm1156_vm9, 1.0, %v2014_v31  ;;  %v2720_v10 = vsel %vm1225_vm10, 1.0, %v2014_v31  ;;  %v2726_v6 = vsel %vm1294_vm11, 1.0, %v2014_v31  ;;  %v1729_v43 = vsel %vm814_vm13, 1.0, %v2014_v31 }
  0x83   : >> { %v2729_v57 = vadd.f32 %v1846_v21, %v1274_v46  ;;  %v997_v49 = vadd.f32 %v1760_v61, %v928_v23  ;;  %vm883_vm15 = vcmp.eq.s32.totalorder %v2273_v25, %v2315_v48  ;;  %v585_v39 = vadd.f32 %v1660_v50, %v516_v2 }
  0x84   : >> { %v793_v8 = vadd.f32 %v1712_v5, %v724_v22  ;;  %v1677_v41 = vsel %vm606_vm14, 1.0, %v2014_v31  ;;  %vm264_vm0 = vcmp.eq.s32.totalorder %v2281_v32, %v2175_v26  ;;  %vm333_vm1 = vcmp.eq.s32.totalorder %v2281_v32, %v2179_v28 }
  0x85   : >> { %vm952_vm2 = vcmp.eq.s32.totalorder %v2273_v25, %v2336_v59  ;;  %vm675_vm3 = vcmp.eq.s32.totalorder %v2269_v24, %v2232_v53  ;;  %v1595_v20 = vsel %vm264_vm0, 1.0, %v2014_v31  ;;  %v1612_v21 = vsel %vm333_vm1, 1.0, %v2014_v31 }
  0x86   : >> { %v381_v9 = vadd.f32 %v1612_v21, %v1595_v20  ;;  %vm402_vm4 = vcmp.eq.s32.totalorder %v2281_v32, %v2182_v29  ;;  %vm471_vm5 = vcmp.eq.s32.totalorder %v2281_v32, %v2191_v30  ;;  %vm540_vm6 = vcmp.eq.s32.totalorder %v2281_v32, %v2199_v35 }
  0x87   : >> { %v1066_v62 = vadd.f32 %v1777_v4, %v997_v49  ;;  %v654_v3 = vadd.f32 %v1677_v41, %v585_v39  ;;  %v1629_v38 = vsel %vm402_vm4, 1.0, %v2014_v31  ;;  %v1646_v54 = vsel %vm471_vm5, 1.0, %v2014_v31 }
  0x88   : >> { %v862_v46 = vadd.f32 %v1729_v43, %v793_v8  ;;  %v1694_v23 = vsel %vm675_vm3, 1.0, %v2014_v31  ;;  %v450_v2 = vadd.f32 %v1629_v38, %v381_v9  ;;  %vm609_vm7 = vcmp.eq.s32.totalorder %v2281_v32, %v2213_v44 }
  0x89   : >> { %v1746_v61 = vsel %vm883_vm15, 1.0, %v2014_v31  ;;  %vm1021_vm8 = vcmp.eq.s32.totalorder %v2273_v25, %v2353_v1  ;;  %vm744_vm9 = vcmp.eq.s32.totalorder %v2269_v24, %v2246_v60  ;;  %v1663_v22 = vsel %vm540_vm6, 1.0, %v2014_v31 }
  0x8a   : >> { %vm1090_vm10 = vcmp.eq.s32.totalorder %v2273_v25, %v2362_v36  ;;  %vm1159_vm11 = vcmp.eq.s32.totalorder %v2273_v25, %v2365_v37  ;;  %v519_v50 = vadd.f32 %v1646_v54, %v450_v2  ;;  %vm678_vm12 = vcmp.eq.s32.totalorder %v2281_v32, %v2232_v53 }
  0x8b   : >> { %v1135_v4 = vadd.f32 %v1794_v11, %v1066_v62  ;;  %vm1228_vm13 = vcmp.eq.s32.totalorder %v2273_v25, %v2376_v40  ;;  %v723_v5 = vadd.f32 %v1694_v23, %v654_v3  ;;  %v1680_v43 = vsel %vm609_vm7, 1.0, %v2014_v31 }
  0x8c   : >> { %v931_v49 = vadd.f32 %v1746_v61, %v862_v46  ;;  %v1711_v39 = vsel %vm744_vm9, 1.0, %v2014_v31  ;;  %vm813_vm14 = vcmp.eq.s32.totalorder %v2269_v24, %v2295_v42  ;;  %v588_v8 = vadd.f32 %v1663_v22, %v519_v50 }
  0x8d   : >> { %v1763_v41 = vsel %vm952_vm2, 1.0, %v2014_v31  ;;  %v1780_v11 = vsel %vm1021_vm8, 1.0, %v2014_v31  ;;  %v1797_v20 = vsel %vm1090_vm10, 1.0, %v2014_v31  ;;  %v1697_v21 = vsel %vm678_vm12, 1.0, %v2014_v31 }
  0x8e   : >> { %v2787_v9 = vsel %vm1159_vm11, 1.0, %v2014_v31  ;;  %v2790_v62 = vsel %vm1228_vm13, 1.0, %v2014_v31  ;;  %v657_v3 = vadd.f32 %v1680_v43, %v588_v8  ;;  %vm747_vm15 = vcmp.eq.s32.totalorder %v2281_v32, %v2246_v60 }
  0x8f   : >> { %v1204_v38 = vadd.f32 %v1811_v55, %v1135_v4  ;;  %v792_v54 = vadd.f32 %v1711_v39, %v723_v5  ;;  %v1728_v46 = vsel %vm813_vm14, 1.0, %v2014_v31  ;;  %vm882_vm0 = vcmp.eq.s32.totalorder %v2269_v24, %v2315_v48 }
  0x90   : >> { %v1000_v23 = vadd.f32 %v1763_v41, %v931_v49  ;;  %v726_v2 = vadd.f32 %v1697_v21, %v657_v3  ;;  %vm263_vm1 = vcmp.eq.s32.totalorder %v2277_v27, %v2175_v26  ;;  %vm332_vm2 = vcmp.eq.s32.totalorder %v2277_v27, %v2179_v28 }
  0x91   : >> { %v1714_v61 = vsel %vm747_vm15, 1.0, %v2014_v31  ;;  %v1594_v22 = vsel %vm263_vm1, 1.0, %v2014_v31  ;;  %v1611_v55 = vsel %vm332_vm2, 1.0, %v2014_v31  ;;  %vm401_vm3 = vcmp.eq.s32.totalorder %v2277_v27, %v2182_v29 }
  0x92   : >> { %vm816_vm4 = vcmp.eq.s32.totalorder %v2281_v32, %v2295_v42  ;;  %v380_v50 = vadd.f32 %v1611_v55, %v1594_v22  ;;  %v1628_v4 = vsel %vm401_vm3, 1.0, %v2014_v31  ;;  %vm470_vm5 = vcmp.eq.s32.totalorder %v2277_v27, %v2191_v30 }
  0x93   : >> { %vm1297_vm6 = vcmp.eq.s32.totalorder %v2273_v25, %v2387_v45  ;;  %v861_v5 = vadd.f32 %v1728_v46, %v792_v54  ;;  %v1645_v43 = vsel %vm470_vm5, 1.0, %v2014_v31  ;;  %vm539_vm7 = vcmp.eq.s32.totalorder %v2277_v27, %v2199_v35 }
  0x94   : >> { %v1745_v49 = vsel %vm882_vm0, 1.0, %v2014_v31  ;;  %v795_v39 = vadd.f32 %v1714_v61, %v726_v2  ;;  %v449_v8 = vadd.f32 %v1628_v4, %v380_v50  ;;  %vm608_vm8 = vcmp.eq.s32.totalorder %v2277_v27, %v2213_v44 }
  0x95   : >> { %v1273_v41 = vadd.f32 %v2720_v10, %v1204_v38  ;;  %vm951_vm9 = vcmp.eq.s32.totalorder %v2269_v24, %v2336_v59  ;;  %v1731_v21 = vsel %vm816_vm4, 1.0, %v2014_v31  ;;  %v1662_v3 = vsel %vm539_vm7, 1.0, %v2014_v31 }
  0x96   : >> { %v1069_v54 = vadd.f32 %v1780_v11, %v1000_v23  ;;  %vm885_vm10 = vcmp.eq.s32.totalorder %v2281_v32, %v2315_v48  ;;  %v518_v46 = vadd.f32 %v1645_v43, %v449_v8  ;;  %vm677_vm11 = vcmp.eq.s32.totalorder %v2277_v27, %v2232_v53 }
  0x97   : >> { %v1848_v10 = vsel %vm1297_vm6, 1.0, %v2014_v31  ;;  %v930_v38 = vadd.f32 %v1745_v49, %v861_v5  ;;  %vm1020_vm12 = vcmp.eq.s32.totalorder %v2269_v24, %v2353_v1  ;;  %v1679_v2 = vsel %vm608_vm8, 1.0, %v2014_v31 }
  0x98   : >> { %v1762_v11 = vsel %vm951_vm9, 1.0, %v2014_v31  ;;  %v864_v23 = vadd.f32 %v1731_v21, %v795_v39  ;;  %vm954_vm13 = vcmp.eq.s32.totalorder %v2281_v32, %v2336_v59  ;;  %v587_v61 = vadd.f32 %v1662_v3, %v518_v46 }
  0x99   : >> { %v2842_v22 = vadd.f32 %v2726_v6, %v1273_v41  ;;  %v1748_v55 = vsel %vm885_vm10, 1.0, %v2014_v31  ;;  %v1696_v25 = vsel %vm677_vm11, 1.0, %v2014_v31  ;;  %vm746_vm14 = vcmp.eq.s32.totalorder %v2277_v27, %v2246_v60 }
  0x9a   : >> { %v1138_v50 = vadd.f32 %v1797_v20, %v1069_v54  ;;  %v1779_v4 = vsel %vm1020_vm12, 1.0, %v2014_v31  ;;  %vm1089_vm15 = vcmp.eq.s32.totalorder %v2269_v24, %v2362_v36  ;;  %v656_v5 = vadd.f32 %v1679_v2, %v587_v61 }
  0x9b   : >> { %v999_v43 = vadd.f32 %v1762_v11, %v930_v38  ;;  %vm1158_vm0 = vcmp.eq.s32.totalorder %v2269_v24, %v2365_v37  ;;  %v1765_v6 = vsel %vm954_vm13, 1.0, %v2014_v31  ;;  %vm266_vm1 = vcmp.eq.s32.totalorder %v2312_v47, %v2175_v26 }
  0x9c   : >> { %v933_v49 = vadd.f32 %v1748_v55, %v864_v23  ;;  %v725_v39 = vadd.f32 %v1696_v25, %v656_v5  ;;  %v1713_v8 = vsel %vm746_vm14, 1.0, %v2014_v31  ;;  %v1597_v20 = vsel %vm266_vm1, 1.0, %v2014_v31 }
  0x9d   : >> { %vm815_vm2 = vcmp.eq.s32.totalorder %v2277_v27, %v2295_v42  ;;  %vm335_vm3 = vcmp.eq.s32.totalorder %v2312_v47, %v2179_v28  ;;  %vm404_vm4 = vcmp.eq.s32.totalorder %v2312_v47, %v2182_v29  ;;  %vm473_vm5 = vcmp.eq.s32.totalorder %v2312_v47, %v2191_v30 }
  0x9e   : >> { %v1207_v26 = vadd.f32 %v2787_v9, %v1138_v50  ;;  %vm1023_vm6 = vcmp.eq.s32.totalorder %v2281_v32, %v2353_v1  ;;  %v1614_v41 = vsel %vm335_vm3, 1.0, %v2014_v31  ;;  %v1631_v21 = vsel %vm404_vm4, 1.0, %v2014_v31 }
  0x9f   : >> { %v1068_v3 = vadd.f32 %v1779_v4, %v999_v43  ;;  %v794_v54 = vadd.f32 %v1713_v8, %v725_v39  ;;  %v383_v46 = vadd.f32 %v1614_v41, %v1597_v20  ;;  %vm542_vm7 = vcmp.eq.s32.totalorder %v2312_v47, %v2199_v35 }
  0xa0   : >> { %v1796_v28 = vsel %vm1089_vm15, 1.0, %v2014_v31  ;;  %v1002_v29 = vadd.f32 %v1765_v6, %v933_v49  ;;  %v1730_v30 = vsel %vm815_vm2, 1.0, %v2014_v31  ;;  %v1648_v9 = vsel %vm473_vm5, 1.0, %v2014_v31 }
  0xa1   : >> { %vm1227_vm8 = vcmp.eq.s32.totalorder %v2269_v24, %v2376_v40  ;;  %v1782_v38 = vsel %vm1023_vm6, 1.0, %v2014_v31  ;;  %vm884_vm9 = vcmp.eq.s32.totalorder %v2277_v27, %v2315_v48  ;;  %v452_v2 = vadd.f32 %v1631_v21, %v383_v46  ;;  %v2927_v46 = vld [vmem:[%s2146_s7 + $0x1] ss:$0 sm:$0xff] }
  0xa2   : >> { %v1276_v35 = vadd.f32 %v2790_v62, %v1207_v26  ;;  %vm1092_vm10 = vcmp.eq.s32.totalorder %v2281_v32, %v2362_v36  ;;  %v1665_v11 = vsel %vm542_vm7, 1.0, %v2014_v31  ;;  %vm611_vm11 = vcmp.eq.s32.totalorder %v2312_v47, %v2213_v44 }
  0xa3   : >> { %v1137_v61 = vadd.f32 %v1796_v28, %v1068_v3  ;;  %vm1296_vm12 = vcmp.eq.s32.totalorder %v2269_v24, %v2387_v45  ;;  %v863_v55 = vadd.f32 %v1730_v30, %v794_v54  ;;  %v521_v25 = vadd.f32 %v1648_v9, %v452_v2  ;;  %v2932_v28 = vld [vmem:[%s2146_s7 + $0x2] ss:$0 sm:$0xff] }
  0xa4   : >> { %v1813_v62 = vsel %vm1158_vm0, 1.0, %v2014_v31  ;;  %v1071_v50 = vadd.f32 %v1782_v38, %v1002_v29  ;;  %vm1161_vm13 = vcmp.eq.s32.totalorder %v2281_v32, %v2365_v37  ;;  %v1747_v4 = vsel %vm884_vm9, 1.0, %v2014_v31 }
  0xa5   : >> { %v1799_v44 = vsel %vm1092_vm10, 1.0, %v2014_v31  ;;  %vm953_vm14 = vcmp.eq.s32.totalorder %v2277_v27, %v2336_v59  ;;  %v590_v5 = vadd.f32 %v1665_v11, %v521_v25  ;;  %v1682_v43 = vsel %vm611_vm11, 1.0, %v2014_v31 }
  0xa6   : >> { %v2903_v6 = vadd.f32 %v1848_v10, %v1276_v35  ;;  %v1830_v49 = vsel %vm1227_vm8, 1.0, %v2014_v31  ;;  %v2910_v39 = vsel %vm1296_vm12, 1.0, %v2014_v31  ;;  %vm680_vm15 = vcmp.eq.s32.totalorder %v2312_v47, %v2232_v53  ;;  %v2922_v53 = vld [vmem:[%s2146_s7] ss:$0 sm:$0xff] }
  0xa7   : >> { %v1206_v26 = vadd.f32 %v1813_v62, %v1137_v61  ;;  %v1816_v41 = vsel %vm1161_vm13, 1.0, %v2014_v31  ;;  %vm1230_vm0 = vcmp.eq.s32.totalorder %v2281_v32, %v2376_v40  ;;  %v932_v10 = vadd.f32 %v1747_v4, %v863_v55  ;;  %v2950_v61 = vld [vmem:[%s2146_s7 + $0x3] ss:$0 sm:$0xff]  ;;  %v2957_v4 = vld [vmem:[%s2146_s7 + $0x4] ss:$0 sm:$0xff] }
  0xa8   : >> { %v1140_v21 = vadd.f32 %v1799_v44, %v1071_v50  ;;  %v1764_v24 = vsel %vm953_vm14, 1.0, %v2014_v31  ;;  %vm1022_vm1 = vcmp.eq.s32.totalorder %v2277_v27, %v2353_v1  ;;  %v659_v3 = vadd.f32 %v1682_v43, %v590_v5 }
  0xa9   : >> { %v1374_v23 = vpop.permute.xlu0 %1373  ;;  %v1384_v8 = vpop.permute.xlu1 %1383  ;;  %v1699_v54 = vsel %vm680_vm15, 1.0, %v2014_v31  ;;  %vm265_vm2 = vcmp.eq.s32.totalorder %v2285_v34, %v2922_v53  ;;  %vm334_vm3 = vcmp.eq.s32.totalorder %v2285_v34, %v2927_v46  ;;  %vm403_vm4 = vcmp.eq.s32.totalorder %v2285_v34, %v2932_v28 }
  0xaa   : >> { %vm749_vm5 = vcmp.eq.s32.totalorder %v2312_v47, %v2246_v60  ;;  %v1596_v30 = vsel %vm265_vm2, 1.0, %v2014_v31  ;;  %v1613_v9 = vsel %vm334_vm3, 1.0, %v2014_v31  ;;  %v1001_v38 = vadd.f32 %v1764_v24, %v932_v10 }
  0xab   : >> { %vm1091_vm6 = vcmp.eq.s32.totalorder %v2277_v27, %v2362_v36  ;;  %v382_v2 = vadd.f32 %v1613_v9, %v1596_v30  ;;  %v1630_v35 = vsel %vm403_vm4, 1.0, %v2014_v31  ;;  %v1451_v11 = vmul.f32 %v1374_v23, %v2594_v58 }
  0xac   : >> { %v728_v60 = vadd.f32 %v1699_v54, %v659_v3  ;;  %vm472_vm7 = vcmp.eq.s32.totalorder %v2285_v34, %v2950_v61  ;;  %v1716_v25 = vsel %vm749_vm5, 1.0, %v2014_v31  ;;  %vm541_vm8 = vcmp.eq.s32.totalorder %v2285_v34, %v2957_v4  ;;  %v2980_v3 = vld [vmem:[%s2146_s7 + $0x5] ss:$0 sm:$0xff] }
  0xad   : >> { %v1379_v20 = vpop.permute.xlu0 %1378  ;;  %v1389_v55 = vpop.permute.xlu1 %1388  ;;  %v451_v62 = vadd.f32 %v1630_v35, %v382_v2  ;;  %v1647_v50 = vsel %vm472_vm7, 1.0, %v2014_v31  ;;  %v1209_v23 = vadd.f32 %v1816_v41, %v1140_v21  ;;  %vm1299_vm9 = vcmp.eq.s32.totalorder %v2281_v32, %v2387_v45 }
  0xae   : >> { %v1452_v29 = vmul.f32 %v1379_v20, %v2694_v7  ;;  %v1781_v7 = vsel %vm1022_vm1, 1.0, %v2014_v31  ;;  %vm818_vm10 = vcmp.eq.s32.totalorder %v2312_v47, %v2295_v42  ;;  %v1833_v44 = vsel %vm1230_vm0, 1.0, %v2014_v31 }
  0xaf   : >> { %v1070_v5 = vadd.f32 %v1781_v7, %v1001_v38  ;;  %vm1160_vm11 = vcmp.eq.s32.totalorder %v2277_v27, %v2365_v37  ;;  %v520_v43 = vadd.f32 %v1647_v50, %v451_v62  ;;  %v1453_v20 = vmul.f32 %v1384_v8, %v2591_v52  ;;  %v3002_v7 = vld [vmem:[%s2146_s7 + $0x6] ss:$0 sm:$0xff] }
  0xb0   : >> { %v1467_v58 = vadd.f32 %v1452_v29, %v1451_v11  ;;  %v1798_v41 = vsel %vm1091_vm6, 1.0, %v2014_v31  ;;  %v797_v10 = vadd.f32 %v1716_v25, %v728_v60  ;;  %v1664_v42 = vsel %vm541_vm8, 1.0, %v2014_v31 }
  0xb1   : >> { %v1275_v21 = vadd.f32 %v1830_v49, %v1206_v26  ;;  %v1850_v24 = vsel %vm1299_vm9, 1.0, %v2014_v31  ;;  %v1733_v32 = vsel %vm818_vm10, 1.0, %v2014_v31  ;;  %vm610_vm12 = vcmp.eq.s32.totalorder %v2285_v34, %v2980_v3  ;;  %v1399_v8 = vpop.permute.xlu1 %1398  ;;  %v1394_v9 = vpop.permute.xlu0 %1393 }
  0xb2   : >> { %v1468_v54 = vadd.f32 %v1467_v58, %v1453_v20  ;;  %v1278_v52 = vadd.f32 %v1833_v44, %v1209_v23  ;;  %vm1229_vm13 = vcmp.eq.s32.totalorder %v2277_v27, %v2376_v40  ;;  %vm887_vm14 = vcmp.eq.s32.totalorder %v2312_v47, %v2315_v48 }
  0xb3   : >> { %v1139_v49 = vadd.f32 %v1798_v41, %v1070_v5  ;;  %v1815_v26 = vsel %vm1160_vm11, 1.0, %v2014_v31  ;;  %vm1298_vm15 = vcmp.eq.s32.totalorder %v2277_v27, %v2387_v45  ;;  %v589_v29 = vadd.f32 %v1664_v42, %v520_v43 }
  0xb4   : >> { %v1454_v30 = vmul.f32 %v1389_v55, %v2649_v33  ;;  %v866_v38 = vadd.f32 %v1733_v32, %v797_v10  ;;  %vm956_vm0 = vcmp.eq.s32.totalorder %v2312_v47, %v2336_v59  ;;  %v1681_v48 = vsel %vm610_vm12, 1.0, %v2014_v31 }
  0xb5   : >> { %v1344_v2 = vadd.f32 %v2910_v39, %v1275_v21  ;;  %v1832_v35 = vsel %vm1229_vm13, 1.0, %v2014_v31  ;;  %v1750_v11 = vsel %vm887_vm14, 1.0, %v2014_v31  ;;  %vm679_vm1 = vcmp.eq.s32.totalorder %v2285_v34, %v3002_v7  ;;  %v1409_v58 = vpop.permute.xlu1 %1408  ;;  %v1404_v5 = vpop.permute.xlu0 %1403 }
  0xb6   : >> { %v1469_v27 = vadd.f32 %v1468_v54, %v1454_v30  ;;  %v1347_v33 = vadd.f32 %v1850_v24, %v1278_v52  ;;  %v1849_v60 = vsel %vm1298_vm15, 1.0, %v2014_v31  ;;  %vm1025_vm2 = vcmp.eq.s32.totalorder %v2312_v47, %v2353_v1  ;;  %v3020_v1 = vld [vmem:[%s2146_s7 + $0x7] ss:$0 sm:$0xff]  ;;  %v3042_v52 = vld [vmem:[%s2146_s7 + $0x8] ss:$0 sm:$0xff] }
  0xb7   : >> { %v1208_v59 = vadd.f32 %v1815_v26, %v1139_v49  ;;  %v1767_v39 = vsel %vm956_vm0, 1.0, %v2014_v31  ;;  %vm1094_vm3 = vcmp.eq.s32.totalorder %v2312_v47, %v2362_v36  ;;  %v658_v55 = vadd.f32 %v1681_v48, %v589_v29 }
  0xb8   : >> { %v1455_v25 = vmul.f32 %v1394_v9, %v2842_v22  ;;  %v935_v62 = vadd.f32 %v1750_v11, %v866_v38  ;;  %v1698_v50 = vsel %vm679_vm1, 1.0, %v2014_v31  ;;  %vm268_vm4 = vcmp.eq.s32.totalorder %v2332_v56, %v2922_v53  ;;  %v3052_v9 = vld [vmem:[%s2146_s7 + $0x9] ss:$0 sm:$0xff]  ;;  %v3058_v11 = vld [vmem:[%s2146_s7 + $0xa] ss:$0 sm:$0xff] }
  0xb9   : >> { %v1784_v23 = vsel %vm1025_vm2, 1.0, %v2014_v31  ;;  %vm1163_vm5 = vcmp.eq.s32.totalorder %v2312_v47, %v2365_v37  ;;  %vm748_vm6 = vcmp.eq.s32.totalorder %v2285_v34, %v3020_v1  ;;  %v1599_v44 = vsel %vm268_vm4, 1.0, %v2014_v31  ;;  %v1419_v26 = vpop.permute.xlu1 %1418  ;;  %v1414_v38 = vpop.permute.xlu0 %1413 }
  0xba   : >> { %v1470_v22 = vadd.f32 %v1469_v27, %v1455_v25  ;;  %vm337_vm7 = vcmp.eq.s32.totalorder %v2332_v56, %v2927_v46  ;;  %vm406_vm8 = vcmp.eq.s32.totalorder %v2332_v56, %v2932_v28  ;;  %vm475_vm9 = vcmp.eq.s32.totalorder %v2332_v56, %v2950_v61 }
  0xbb   : >> { %v1277_v43 = vadd.f32 %v1832_v35, %v1208_v59  ;;  %v727_v20 = vadd.f32 %v1698_v50, %v658_v55  ;;  %v1616_v41 = vsel %vm337_vm7, 1.0, %v2014_v31  ;;  %v1633_v10 = vsel %vm406_vm8, 1.0, %v2014_v31 }
  0xbc   : >> { %v1456_v42 = vmul.f32 %v1399_v8, %v2729_v57  ;;  %v1004_v21 = vadd.f32 %v1767_v39, %v935_v62  ;;  %v1715_v24 = vsel %vm748_vm6, 1.0, %v2014_v31  ;;  %v385_v32 = vadd.f32 %v1616_v41, %v1599_v44  ;;  %v3113_v41 = vld [vmem:[%s2146_s7 + $0xc] ss:$0 sm:$0xff] }
  0xbd   : >> { %v1801_v54 = vsel %vm1094_vm3, 1.0, %v2014_v31  ;;  %vm1232_vm10 = vcmp.eq.s32.totalorder %v2312_v47, %v2376_v40  ;;  %vm817_vm11 = vcmp.eq.s32.totalorder %v2285_v34, %v3042_v52  ;;  %v1650_v57 = vsel %vm475_vm9, 1.0, %v2014_v31 }
  0xbe   : >> { %v1471_v8 = vadd.f32 %v1470_v22, %v1456_v42  ;;  %vm1301_vm12 = vcmp.eq.s32.totalorder %v2312_v47, %v2387_v45  ;;  %v454_v49 = vadd.f32 %v1633_v10, %v385_v32  ;;  %vm544_vm13 = vcmp.eq.s32.totalorder %v2332_v56, %v2957_v4 }
  0xbf   : >> { %v1457_v36 = vmul.f32 %v1404_v5, %v1344_v2  ;;  %v1346_v29 = vadd.f32 %v1849_v60, %v1277_v43  ;;  %v796_v30 = vadd.f32 %v1715_v24, %v727_v20  ;;  %vm886_vm14 = vcmp.eq.s32.totalorder %v2285_v34, %v3052_v9 }
  0xc0   : >> { %v1073_v48 = vadd.f32 %v1784_v23, %v1004_v21  ;;  %v1732_v35 = vsel %vm817_vm11, 1.0, %v2014_v31  ;;  %vm955_vm15 = vcmp.eq.s32.totalorder %v2285_v34, %v3058_v11  ;;  %v523_v27 = vadd.f32 %v1650_v57, %v454_v49  ;;  %v3126_v57 = vld [vmem:[%s2146_s7 + $0xd] ss:$0 sm:$0xff] }
  0xc1   : >> { %v1818_v2 = vsel %vm1163_vm5, 1.0, %v2014_v31  ;;  %v1835_v60 = vsel %vm1232_vm10, 1.0, %v2014_v31  ;;  %v3074_v59 = vsel %vm1301_vm12, 1.0, %v2014_v31  ;;  %v1667_v39 = vsel %vm544_vm13, 1.0, %v2014_v31 }
  0xc2   : >> { %v1458_v37 = vmul.f32 %v1409_v58, %v2903_v6  ;;  %v1472_v55 = vadd.f32 %v1471_v8, %v1457_v36  ;;  %v3081_v25 = vmul.f32 %v1419_v26, %v1347_v33  ;;  %vm613_vm0 = vcmp.eq.s32.totalorder %v2332_v56, %v2980_v3  ;;  %v3095_v6 = vld [vmem:[%s2146_s7 + $0xb] ss:$0 sm:$0xff]  ;;  %v3135_v26 = vld [vmem:[%s2146_s7 + $0xe] ss:$0 sm:$0xff] }
  0xc3   : >> { %v1459_v40 = vmul.f32 %v1414_v38, %v1346_v29  ;;  %v865_v62 = vadd.f32 %v1732_v35, %v796_v30  ;;  %v1749_v47 = vsel %vm886_vm14, 1.0, %v2014_v31  ;;  %v1766_v45 = vsel %vm955_vm15, 1.0, %v2014_v31 }
  0xc4   : >> { %v1142_v50 = vadd.f32 %v1801_v54, %v1073_v48  ;;  %v592_v23 = vadd.f32 %v1667_v39, %v523_v27  ;;  %vm267_vm1 = vcmp.eq.s32.totalorder %v2321_v51, %v2922_v53  ;;  %vm336_vm2 = vcmp.eq.s32.totalorder %v2321_v51, %v2927_v46 }
  0xc5   : >> { %vm1024_vm3 = vcmp.eq.s32.totalorder %v2285_v34, %v3095_v6  ;;  %v1684_v33 = vsel %vm613_vm0, 1.0, %v2014_v31  ;;  %v1598_v58 = vsel %vm267_vm1, 1.0, %v2014_v31  ;;  %v1615_v44 = vsel %vm336_vm2, 1.0, %v2014_v31 }
  0xc6   : >> { %vm682_vm4 = vcmp.eq.s32.totalorder %v2332_v56, %v3002_v7  ;;  %v384_v22 = vadd.f32 %v1615_v44, %v1598_v58  ;;  %vm405_vm5 = vcmp.eq.s32.totalorder %v2321_v51, %v2932_v28  ;;  %vm474_vm6 = vcmp.eq.s32.totalorder %v2321_v51, %v2950_v61 }
  0xc7   : >> { %v934_v5 = vadd.f32 %v1749_v47, %v865_v62  ;;  %v1632_v43 = vsel %vm405_vm5, 1.0, %v2014_v31  ;;  %v1649_v20 = vsel %vm474_vm6, 1.0, %v2014_v31  ;;  %vm543_vm7 = vcmp.eq.s32.totalorder %v2321_v51, %v2957_v4 }
  0xc8   : >> { %vm1093_vm8 = vcmp.eq.s32.totalorder %v2285_v34, %v3113_v41  ;;  %v661_v10 = vadd.f32 %v1684_v33, %v592_v23  ;;  %v453_v42 = vadd.f32 %v1632_v43, %v384_v22  ;;  %vm612_vm9 = vcmp.eq.s32.totalorder %v2321_v51, %v2980_v3 }
  0xc9   : >> { %v1473_v21 = vadd.f32 %v1472_v55, %v1458_v37  ;;  %v1783_v24 = vsel %vm1024_vm3, 1.0, %v2014_v31  ;;  %v1701_v32 = vsel %vm682_vm4, 1.0, %v2014_v31  ;;  %v1666_v54 = vsel %vm543_vm7, 1.0, %v2014_v31  ;;  %v3155_v55 = vld [vmem:[%s2146_s7 + $0xf] ss:$0 sm:$0xff] }
  0xca   : >> { %vm1162_vm10 = vcmp.eq.s32.totalorder %v2285_v34, %v3126_v57  ;;  %vm751_vm11 = vcmp.eq.s32.totalorder %v2332_v56, %v3020_v1  ;;  %v522_v8 = vadd.f32 %v1649_v20, %v453_v42  ;;  %vm681_vm12 = vcmp.eq.s32.totalorder %v2321_v51, %v3002_v7 }
  0xcb   : >> { %v1211_v49 = vadd.f32 %v1818_v2, %v1142_v50  ;;  %v1003_v36 = vadd.f32 %v1766_v45, %v934_v5  ;;  %vm1231_vm13 = vcmp.eq.s32.totalorder %v2285_v34, %v3135_v26  ;;  %v1683_v29 = vsel %vm612_vm9, 1.0, %v2014_v31 }
  0xcc   : >> { %v1800_v30 = vsel %vm1093_vm8, 1.0, %v2014_v31  ;;  %v730_v38 = vadd.f32 %v1701_v32, %v661_v10  ;;  %v591_v48 = vadd.f32 %v1666_v54, %v522_v8  ;;  %vm750_vm14 = vcmp.eq.s32.totalorder %v2321_v51, %v3020_v1 }
  0xcd   : >> { %v1817_v35 = vsel %vm1162_vm10, 1.0, %v2014_v31  ;;  %v1718_v27 = vsel %vm751_vm11, 1.0, %v2014_v31  ;;  %vm820_vm15 = vcmp.eq.s32.totalorder %v2332_v56, %v3042_v52  ;;  %v1700_v2 = vsel %vm681_vm12, 1.0, %v2014_v31 }
  0xce   : >> { %v1474_v39 = vadd.f32 %v1473_v21, %v1459_v40  ;;  %v3152_v37 = vsel %vm1231_vm13, 1.0, %v2014_v31  ;;  %vm1300_vm0 = vcmp.eq.s32.totalorder %v2285_v34, %v3155_v55  ;;  %v660_v62 = vadd.f32 %v1683_v29, %v591_v48 }
  0xcf   : >> { %v1280_v47 = vadd.f32 %v1835_v60, %v1211_v49  ;;  %v1072_v45 = vadd.f32 %v1783_v24, %v1003_v36  ;;  %v1717_v50 = vsel %vm750_vm14, 1.0, %v2014_v31  ;;  %vm819_vm1 = vcmp.eq.s32.totalorder %v2321_v51, %v3042_v52 }
  0xd0   : >> { %v799_v23 = vadd.f32 %v1718_v27, %v730_v38  ;;  %v1735_v33 = vsel %vm820_vm15, 1.0, %v2014_v31  ;;  %vm889_vm2 = vcmp.eq.s32.totalorder %v2332_v56, %v3052_v9  ;;  %v729_v40 = vadd.f32 %v1700_v2, %v660_v62 }
  0xd1   : >> { %vm270_vm3 = vcmp.eq.s32.totalorder %v2350_v0, %v2922_v53  ;;  %vm339_vm4 = vcmp.eq.s32.totalorder %v2350_v0, %v2927_v46  ;;  %vm408_vm5 = vcmp.eq.s32.totalorder %v2350_v0, %v2932_v28  ;;  %vm477_vm6 = vcmp.eq.s32.totalorder %v2350_v0, %v2950_v61 }
  0xd2   : >> { %v798_v60 = vadd.f32 %v1717_v50, %v729_v40  ;;  %v1734_v58 = vsel %vm819_vm1, 1.0, %v2014_v31  ;;  %v1601_v44 = vsel %vm270_vm3, 1.0, %v2014_v31  ;;  %v1618_v22 = vsel %vm339_vm4, 1.0, %v2014_v31 }
  0xd3   : >> { %vm888_vm7 = vcmp.eq.s32.totalorder %v2321_v51, %v3052_v9  ;;  %v387_v5 = vadd.f32 %v1618_v22, %v1601_v44  ;;  %v1635_v43 = vsel %vm408_vm5, 1.0, %v2014_v31  ;;  %vm546_vm8 = vcmp.eq.s32.totalorder %v2350_v0, %v2957_v4 }
  0xd4   : >> { %v3185_v20 = vsel %vm1300_vm0, 1.0, %v2014_v31  ;;  %v868_v10 = vadd.f32 %v1735_v33, %v799_v23  ;;  %vm958_vm9 = vcmp.eq.s32.totalorder %v2332_v56, %v3058_v11  ;;  %v1652_v42 = vsel %vm477_vm6, 1.0, %v2014_v31 }
  0xd5   : >> { %v1752_v21 = vsel %vm889_vm2, 1.0, %v2014_v31  ;;  %v867_v24 = vadd.f32 %v1734_v58, %v798_v60  ;;  %v456_v32 = vadd.f32 %v1635_v43, %v387_v5  ;;  %vm615_vm10 = vcmp.eq.s32.totalorder %v2350_v0, %v2980_v3 }
  0xd6   : >> { %v3197_v34 = vadd.f32 %v1474_v39, %v3081_v25  ;;  %vm1027_vm11 = vcmp.eq.s32.totalorder %v2332_v56, %v3095_v6  ;;  %v1751_v54 = vsel %vm888_vm7, 1.0, %v2014_v31  ;;  %v1669_v8 = vsel %vm546_vm8, 1.0, %v2014_v31 }
  0xd7   : >> { %v1141_v49 = vadd.f32 %v1800_v30, %v1072_v45  ;;  %vm957_vm12 = vcmp.eq.s32.totalorder %v2321_v51, %v3058_v11  ;;  %v525_v36 = vadd.f32 %v1652_v42, %v456_v32  ;;  %vm684_vm13 = vcmp.eq.s32.totalorder %v2350_v0, %v3002_v7 }
  0xd8   : >> { %v3208_v29 = vadd.f32 %v3074_v59, %v1280_v47  ;;  %v937_v25 = vadd.f32 %v1752_v21, %v868_v10  ;;  %v1769_v38 = vsel %vm958_vm9, 1.0, %v2014_v31  ;;  %v1686_v48 = vsel %vm615_vm10, 1.0, %v2014_v31 }
  0xd9   : >> { %v936_v27 = vadd.f32 %v1751_v54, %v867_v24  ;;  %vm1026_vm14 = vcmp.eq.s32.totalorder %v2321_v51, %v3095_v6  ;;  %v594_v30 = vadd.f32 %v1669_v8, %v525_v36  ;;  %vm753_vm15 = vcmp.eq.s32.totalorder %v2350_v0, %v3020_v1 }
  0xda   : >> { %v1786_v2 = vsel %vm1027_vm11, 1.0, %v2014_v31  ;;  %vm1096_vm0 = vcmp.eq.s32.totalorder %v2332_v56, %v3113_v41  ;;  %v1768_v59 = vsel %vm957_vm12, 1.0, %v2014_v31  ;;  %v1703_v39 = vsel %vm684_vm13, 1.0, %v2014_v31 }
  0xdb   : >> { %v1210_v62 = vadd.f32 %v1817_v35, %v1141_v49  ;;  %vm1095_vm1 = vcmp.eq.s32.totalorder %v2321_v51, %v3113_v41  ;;  %v663_v47 = vadd.f32 %v1686_v48, %v594_v30  ;;  %vm822_vm2 = vcmp.eq.s32.totalorder %v2350_v0, %v3042_v52 }
  0xdc   : >> { %v1006_v45 = vadd.f32 %v1769_v38, %v937_v25  ;;  %v1785_v50 = vsel %vm1026_vm14, 1.0, %v2014_v31  ;;  %v1720_v23 = vsel %vm753_vm15, 1.0, %v2014_v31  ;;  %vm891_vm3 = vcmp.eq.s32.totalorder %v2350_v0, %v3052_v9 }
  0xdd   : >> { %v1005_v33 = vadd.f32 %v1768_v59, %v936_v27  ;;  %v732_v40 = vadd.f32 %v1703_v39, %v663_v47  ;;  %vm269_vm4 = vcmp.eq.s32.totalorder %v2346_v63, %v2922_v53  ;;  %vm338_vm5 = vcmp.eq.s32.totalorder %v2346_v63, %v2927_v46  ;;  %v1424_v59 = vpop.permute.xlu0 %1423 }
  0xde   : >> { %v1737_v35 = vsel %vm822_vm2, 1.0, %v2014_v31  ;;  %vm960_vm6 = vcmp.eq.s32.totalorder %v2350_v0, %v3058_v11  ;;  %v1600_v60 = vsel %vm269_vm4, 1.0, %v2014_v31  ;;  %v1617_v58 = vsel %vm338_vm5, 1.0, %v2014_v31 }
  0xdf   : >> { %v801_v44 = vadd.f32 %v1720_v23, %v732_v40  ;;  %v386_v22 = vadd.f32 %v1617_v58, %v1600_v60  ;;  %vm407_vm7 = vcmp.eq.s32.totalorder %v2346_v63, %v2932_v28  ;;  %vm476_vm8 = vcmp.eq.s32.totalorder %v2346_v63, %v2950_v61 }
  0xe0   : >> { %v1754_v53 = vsel %vm891_vm3, 1.0, %v2014_v31  ;;  %v1634_v46 = vsel %vm407_vm7, 1.0, %v2014_v31  ;;  %v1651_v5 = vsel %vm476_vm8, 1.0, %v2014_v31  ;;  %vm545_vm9 = vcmp.eq.s32.totalorder %v2346_v63, %v2957_v4 }
  0xe1   : >> { %v1074_v43 = vadd.f32 %v1785_v50, %v1005_v33  ;;  %v870_v10 = vadd.f32 %v1737_v35, %v801_v44  ;;  %v455_v42 = vadd.f32 %v1634_v46, %v386_v22  ;;  %vm614_vm10 = vcmp.eq.s32.totalorder %v2346_v63, %v2980_v3 }
  0xe2   : >> { %v1803_v28 = vsel %vm1096_vm0, 1.0, %v2014_v31  ;;  %vm1165_vm11 = vcmp.eq.s32.totalorder %v2332_v56, %v3126_v57  ;;  %v1802_v61 = vsel %vm1095_vm1, 1.0, %v2014_v31  ;;  %v1668_v4 = vsel %vm545_vm9, 1.0, %v2014_v31 }
  0xe3   : >> { %vm1164_vm12 = vcmp.eq.s32.totalorder %v2321_v51, %v3126_v57  ;;  %v939_v21 = vadd.f32 %v1754_v53, %v870_v10  ;;  %v524_v3 = vadd.f32 %v1651_v5, %v455_v42  ;;  %vm683_vm13 = vcmp.eq.s32.totalorder %v2346_v63, %v3002_v7  ;;  %v1434_v42 = vpop.permute.xlu0 %1433 }
  0xe4   : >> { %v1279_v24 = vadd.f32 %v3152_v37, %v1210_v62  ;;  %v1075_v32 = vadd.f32 %v1786_v2, %v1006_v45  ;;  %v1771_v54 = vsel %vm960_vm6, 1.0, %v2014_v31  ;;  %v1685_v8 = vsel %vm614_vm10, 1.0, %v2014_v31  ;;  %v1429_v45 = vpop.permute.xlu1 %1428 }
  0xe5   : >> { %v1143_v49 = vadd.f32 %v1802_v61, %v1074_v43  ;;  %vm1029_vm14 = vcmp.eq.s32.totalorder %v2350_v0, %v3095_v6  ;;  %v593_v36 = vadd.f32 %v1668_v4, %v524_v3  ;;  %vm752_vm15 = vcmp.eq.s32.totalorder %v2346_v63, %v3020_v1 }
  0xe6   : >> { %v1820_v7 = vsel %vm1165_vm11, 1.0, %v2014_v31  ;;  %vm1234_vm0 = vcmp.eq.s32.totalorder %v2332_v56, %v3135_v26  ;;  %v1819_v37 = vsel %vm1164_vm12, 1.0, %v2014_v31  ;;  %v1702_v25 = vsel %vm683_vm13, 1.0, %v2014_v31 }
  0xe7   : >> { %vm1233_vm1 = vcmp.eq.s32.totalorder %v2321_v51, %v3135_v26  ;;  %v1008_v38 = vadd.f32 %v1771_v54, %v939_v21  ;;  %v662_v48 = vadd.f32 %v1685_v8, %v593_v36  ;;  %vm821_vm2 = vcmp.eq.s32.totalorder %v2346_v63, %v3042_v52 }
  0xe8   : >> { %v1348_v27 = vadd.f32 %v3185_v20, %v1279_v24  ;;  %v1144_v1 = vadd.f32 %v1803_v28, %v1075_v32  ;;  %v1788_v30 = vsel %vm1029_vm14, 1.0, %v2014_v31  ;;  %v1719_v2 = vsel %vm752_vm15, 1.0, %v2014_v31 }
  0xe9   : >> { %v1212_v39 = vadd.f32 %v1819_v37, %v1143_v49  ;;  %vm1098_vm3 = vcmp.eq.s32.totalorder %v2350_v0, %v3113_v41  ;;  %v731_v62 = vadd.f32 %v1702_v25, %v662_v48  ;;  %vm890_vm4 = vcmp.eq.s32.totalorder %v2346_v63, %v3052_v9 }
  0xea   : >> { %v1837_v52 = vsel %vm1234_vm0, 1.0, %v2014_v31  ;;  %vm1303_vm5 = vcmp.eq.s32.totalorder %v2332_v56, %v3155_v55  ;;  %v1836_v20 = vsel %vm1233_vm1, 1.0, %v2014_v31  ;;  %v1736_v47 = vsel %vm821_vm2, 1.0, %v2014_v31 }
  0xeb   : >> { %vm1302_vm6 = vcmp.eq.s32.totalorder %v2321_v51, %v3155_v55  ;;  %v1077_v50 = vadd.f32 %v1788_v30, %v1008_v38  ;;  %v800_v23 = vadd.f32 %v1719_v2, %v731_v62  ;;  %vm959_vm7 = vcmp.eq.s32.totalorder %v2346_v63, %v3058_v11  ;;  %v1444_v38 = vpop.permute.xlu0 %1443 }
  0xec   : >> { %v1461_v9 = vmul.f32 %v1424_v59, %v1348_v27  ;;  %v1213_v33 = vadd.f32 %v1820_v7, %v1144_v1  ;;  %v1805_v40 = vsel %vm1098_vm3, 1.0, %v2014_v31  ;;  %v1753_v35 = vsel %vm890_vm4, 1.0, %v2014_v31 }
  0xed   : >> { %v1281_v60 = vadd.f32 %v1836_v20, %v1212_v39  ;;  %vm1167_vm8 = vcmp.eq.s32.totalorder %v2350_v0, %v3126_v57  ;;  %v869_v58 = vadd.f32 %v1736_v47, %v800_v23  ;;  %vm1028_vm9 = vcmp.eq.s32.totalorder %v2346_v63, %v3095_v6 }
  0xee   : >> { %v1462_v51 = vmul.f32 %v1429_v45, %v3208_v29  ;;  %v1853_v44 = vsel %vm1302_vm6, 1.0, %v2014_v31  ;;  %v1770_v11 = vsel %vm959_vm7, 1.0, %v2014_v31  ;;  %v1476_v22 = vadd.f32 %v3197_v34, %v1461_v9 }
  0xef   : >> { %v1146_v53 = vadd.f32 %v1805_v40, %v1077_v50  ;;  %v938_v46 = vadd.f32 %v1753_v35, %v869_v58  ;;  %vm1097_vm10 = vcmp.eq.s32.totalorder %v2346_v63, %v3113_v41  ;;  %v1282_v5 = vadd.f32 %v1837_v52, %v1213_v33 }
  0xf0   : >> { %v1854_v43 = vsel %vm1303_vm5, 1.0, %v2014_v31  ;;  %v1822_v6 = vsel %vm1167_vm8, 1.0, %v2014_v31  ;;  %v1787_v29 = vsel %vm1028_vm9, 1.0, %v2014_v31  ;;  %v1350_v10 = vadd.f32 %v1853_v44, %v1281_v60 }
  0xf1   : >> { %vm1236_vm11 = vcmp.eq.s32.totalorder %v2350_v0, %v3135_v26  ;;  %v1007_v34 = vadd.f32 %v1770_v11, %v938_v46  ;;  %vm1166_vm12 = vcmp.eq.s32.totalorder %v2346_v63, %v3126_v57  ;;  %v1804_v41 = vsel %vm1097_vm10, 1.0, %v2014_v31  ;;  %v1439_v57 = vpop.permute.xlu1 %1438 }
  0xf2   : >> { %v1477_v28 = vadd.f32 %v1476_v22, %v1462_v51  ;;  %v1215_v61 = vadd.f32 %v1822_v6, %v1146_v53  ;;  %vm1235_vm13 = vcmp.eq.s32.totalorder %v2346_v63, %v3135_v26  ;;  %v1351_v56 = vadd.f32 %v1854_v43, %v1282_v5 }
  0xf3   : >> { %v1076_v4 = vadd.f32 %v1787_v29, %v1007_v34  ;;  %v1839_v21 = vsel %vm1236_vm11, 1.0, %v2014_v31  ;;  %v1821_v3 = vsel %vm1166_vm12, 1.0, %v2014_v31  ;;  %v1463_v24 = vmul.f32 %v1434_v42, %v1350_v10 }
  0xf4   : >> { %vm1305_vm14 = vcmp.eq.s32.totalorder %v2350_v0, %v3155_v55  ;;  %vm1304_vm15 = vcmp.eq.s32.totalorder %v2346_v63, %v3155_v55  ;;  %v1838_v54 = vsel %vm1235_vm13, 1.0, %v2014_v31  ;;  %v1284_v49 = vadd.f32 %v1839_v21, %v1215_v61 }
  0xf5   : >> { %v1145_v32 = vadd.f32 %v1804_v41, %v1076_v4  ;;  %v1478_v8 = vadd.f32 %v1477_v28, %v1463_v24  ;;  %v1856_v26 = vsel %vm1305_vm14, 1.0, %v2014_v31  ;;  %v1855_v7 = vsel %vm1304_vm15, 1.0, %v2014_v31  ;;  %v1449_v1 = vpop.permute.xlu1 %1448 }
  0xf6   : >> { %v1464_v37 = vmul.f32 %v1439_v57, %v1351_v56  ;;  %v1353_v48 = vadd.f32 %v1856_v26, %v1284_v49  ;;  %v1490_v31 = vstv (%p227_p13), %s1489_s18 }
  0xf7   : >> { %v1214_v36 = vadd.f32 %v1821_v3, %v1145_v32 }
  0xf8   : >> { %v1479_v0 = vadd.f32 %v1478_v8, %v1464_v37  ;;  %v1466_v2 = vmul.f32 %v1449_v1, %v1353_v48 }
  0xf9   : >> { %v1283_v25 = vadd.f32 %v1838_v54, %v1214_v36 }
  0xfb   : >> { %v1352_v27 = vadd.f32 %v1855_v7, %v1283_v25 }
  0xfd   : >> { %v1465_v30 = vmul.f32 %v1444_v38, %v1352_v27 }
  0xff   : >> { %v1480_v63 = vadd.f32 %v1479_v0, %v1465_v30 }
 0x101   : >> { %v1481_v55 = vadd.f32 %v1480_v63, %v1466_v2 }
 0x103   : >> { %v1482_v59 = vrot.slane %v1481_v55, 4 }
 0x105   : >> { %v1483_v39 = vadd.f32 %v1482_v59, %v1481_v55 }
 0x107   : >> { %v1484_v62 = vrot.slane %v1483_v39, 2 }
 0x109   : >> { %v1485_v52 = vadd.f32 %v1484_v62, %v1483_v39 }
 0x10b   : >> { %v1486_v20 = vrot.slane %v1485_v52, 1 }
 0x10d   : >> { %v1487_v47 = vadd.f32 %v1486_v20, %v1485_v52  ;;  %229 = sbr.rel (!%p227_p13) target bundleno = 43 (0x2b), region = 118 }
 0x10f   : >> { %v1488_v45 = vadd.f32 %v2007_v19, %v1487_v47  }
 0x111   : >> { %v3411_v19 = vmov %v1488_v45 }
 0x112   : > { %v1491_v19 = vadd.f32 %v1490_v31, %v1488_v45 }
 0x114   : > { %1492 = vst [vmem:[%s207_s8] sm:$0x1] %v1491_v19 }
 0x115   : > { %1948 = shalt.err (!%p1945_p7)
}
 0x116   : > { %s1949_s6 = scalar_lea.hbm %s1504_s27, 16  ;;  %s1953_s8 = scalar_lea.hbm %s3388_s3, 32 }
 0x117   : > { %p1950_p10 = scmp.ne.s32.totalorder %s1504_s27, %s1949_s6  ;;  %p1954_p13 = scmp.lt.s32.totalorder %s1504_s27, %s3388_s3 }
 0x118   : > { %p1955_p0 = scmp.lt.s32.totalorder %s1953_s8, %s1949_s6 }
 0x119   : > { %p1951_p11 = pnand %p1950_p10, %p2077_p6 }
 0x11a   : > { %p1956_p1 = por %p1955_p0, %p1954_p13 }
 0x11b   : > { %p1952_p12 = pneg %p1951_p11 }
 0x11d   : > { %p1957_p9 = pnand %p1956_p1, %p1952_p12 }
 0x11f   : > { %1960 = shalt.err (!%p1957_p9)
}
 0x120   : > { %1860 = dma.vmem_to_hbm [thread:$0]  (%p2077_p6), %s1507_s21, 16, %s1504_s27, %s1494_s28  }
 0x121 PF: > { %s1518_s11 = sand.u32 1, %s1991_s14   ;;  %p3412_p2 = scmp.ge.s32.totalorder %s2003_s17, 2 }
 0x122   : > { %s1519_s12 = scalar_lea.sflag [#allocation5], %s1518_s11 }
 0x123   : > { %p1863_p3 = pnand %p3412_p2, %p2081_p8 }
 0x125   : > { %p1864_p4 = pneg %p1863_p3 }
 0x127   : > { %1986 = dma.done.wait (%p1864_p4), %s1519_s12, 16  }
 0x128   : > { %1988 = vsyncadd (%p1864_p4), %s1519_s12, 4294967280  ;;  %p14_p9 = scmp.ge.s32.totalorder %s2062_s19, 4   ;;  %s3413_s14 = smov %s1995_s15 }
 0x129   : > { %s3414_s15 = smov %s1999_s16  ;;  %s3415_s16 = smov %s2075_s22 }
 0x12a   : > { %s3416_s17 = smov %s2062_s19  ;;  %16 = sbr.rel (!%p14_p9) target bundleno = 5 (0x5), region = 129 }
 0x12f   :  { %1523 = vsyncpa [#allocation5], 1 }
 0x130   :  { %1525 = vsyncpa [#allocation5 + $0x1], 1 }

</bundles_post_ra>
